<compile_context>
chip_gen: v7x
topology: tpu7x:2x2x1
jax: 0.10.0
libtpu: 0.0.40
codegen_flags: <defaults>
</compile_context>

<pallas_src>
import functools

import jax
import jax.numpy as jnp
from jax import lax
from jax.experimental import pallas as pl
from jax.experimental.pallas import tpu as pltpu


# bf16 operands feed the MXU natively on v5e/v6e/v7x (accumulation stays f32
# via preferred_element_type); the self-test tolerance is loosened accordingly.
MATMUL_DTYPE = jnp.bfloat16

_OP_TABLE = {0: (3, 1), 1: (3, 3), 2: (3, 6), 3: (5, 1), 4: (5, 3), 5: (5, 6)}


def _round_up(x, m):
    return (x + m - 1) // m * m


def _sl(start, size, stride):
    """Static slice helper: plain pl.ds for stride 1, strided pl.ds otherwise."""
    if stride == 1:
        return pl.ds(start, size)
    return pl.ds(start, size, stride)


def _pick_vmem_limit():
    """Generation-aware VMEM budget: ~96 MiB on 128 MiB parts (v5e/v6e),
    48 MiB on 64 MiB parts (v7x); conservative fallback if the query fails."""
    try:
        cap = int(pltpu.get_tpu_info().vmem_capacity_bytes)
        return min(cap * 3 // 4, 100 * 1024 * 1024)
    except Exception:
        return 48 * 1024 * 1024


def _pick_images_per_step(batch, per_image_io_bytes, scratch_bytes, budget):
    """Largest batch-divisor Bt that keeps >=2 grid steps (pipeline steady
    state / 2 TCs on v7x) and fits comfortably in the VMEM budget."""
    best = 1
    for bt in range(1, batch + 1):
        if batch % bt:
            continue
        if bt > 1 and batch // bt < 2:
            continue
        # inputs/outputs are double-buffered by the auto-pipeline
        if 2 * bt * per_image_io_bytes + scratch_bytes > budget // 2:
            continue
        best = bt
    return best


# ----------------------------------------------------------------------------
# Fused Pallas kernel: expand (1x1) + depthwise (KxK) + pointwise (1x1)
# ----------------------------------------------------------------------------
def _fused_mbconv_kernel(x_ref, *refs, Bt, K, H, W, Ho, Wo, sh, sw, pad,
                         has_expand, add_residual, mm_dtype):
    """Bt images per grid step, channels-first I/O.

    x_ref    : (Bt, Cin, H*W)          input tile (channels-first, flat spatial)
    w1/b1    : (Cin, Cmid), (1, Cmid)  1x1 expand weights (BN folded, bf16) + bias
    wd/bd    : (K*K, Cmid), (1, Cmid)  depthwise taps (BN folded, f32) + bias
    wpT/bp   : (Cout, Cmid), (Cout, 1) 1x1 pointwise weights (BN folded, bf16) + bias
    o_ref    : (Bt, Cout, Ho*Wo)       lane-dense output
    hpad_ref : (H+2p, Wp8, Cmid)       VMEM scratch: padded expanded activation
    """
    if has_expand:
        w1_ref, b1_ref, wd_ref, bd_ref, wp_ref, bp_ref, o_ref, hpad_ref = refs
    else:
        wd_ref, bd_ref, wp_ref, bp_ref, o_ref, hpad_ref = refs

    Hp, Wp8, Cmid = hpad_ref.shape
    f32 = jnp.float32

    # Zero ONLY the halo border (the interior is fully overwritten below).
    # Done every grid step so correctness does not depend on how the
    # "parallel" grid axis is split across TensorCores.
    if pad > 0:
        hpad_ref[0:pad, :, :] = jnp.zeros((pad, Wp8, Cmid), f32)
        hpad_ref[pad + H:Hp, :, :] = jnp.zeros((Hp - pad - H, Wp8, Cmid), f32)
        hpad_ref[pad:pad + H, 0:pad, :] = jnp.zeros((H, pad, Cmid), f32)
        hpad_ref[pad:pad + H, pad + W:Wp8, :] = (
            jnp.zeros((H, Wp8 - pad - W, Cmid), f32))

    wd = wd_ref[...]                                      # hoisted out of loops

    for bt in range(Bt):                                  # static unroll, Bt small
        x_cf = x_ref[bt]                                  # (Cin, H*W) channels-first
        xt = x_cf.T                                       # (H*W, Cin) tiny in-VMEM transpose

        # --- stage 1: 1x1 expand (MXU, bf16) + folded-BN bias + ReLU6 -------
        if has_expand:
            h = jnp.dot(xt.astype(mm_dtype), w1_ref[...],
                        preferred_element_type=f32)       # (H*W, Cmid)
            h = jnp.clip(h + b1_ref[0], 0.0, 6.0)
        else:
            h = xt.astype(f32)                            # Cmid == Cin, no act.

        # Stage the expanded activation into the zero-bordered scratch so the
        # K*K depthwise taps are plain (strided) slices.
        hpad_ref[pad:pad + H, pad:pad + W, :] = h.reshape(H, W, Cmid)

        # --- stage 2: KxK depthwise tap-sum (VPU, f32), stride on the reads --
        acc = None
        for kh in range(K):
            for kw in range(K):
                tap = hpad_ref[_sl(kh, Ho, sh), _sl(kw, Wo, sw), :]
                contrib = tap * wd[kh * K + kw, :]
                acc = contrib if acc is None else acc + contrib
        dw = jnp.clip(acc + bd_ref[0], 0.0, 6.0)          # (Ho, Wo, Cmid)

        # --- stage 3: 1x1 pointwise (MXU, bf16), channels-first output -------
        # (Cout, Cmid) x (Ho*Wo, Cmid)^T -> (Cout, Ho*Wo): lane-dense result.
        dw2 = dw.reshape(Ho * Wo, Cmid)
        y = lax.dot_general(wp_ref[...], dw2.astype(mm_dtype),
                            dimension_numbers=(((1,), (1,)), ((), ())),
                            preferred_element_type=f32)   # (Cout, Ho*Wo)
        y = y + bp_ref[...]                               # (Cout, 1) lane-broadcast
        if add_residual:
            y = y + x_cf                                  # lane-dense residual
        o_ref[bt] = y.astype(o_ref.dtype)                 # lane-dense store


# ----------------------------------------------------------------------------
# Wrapper (forward pass of MixedMobileConvs_Compact, BN in inference mode)
# ----------------------------------------------------------------------------
def _full_spec(arr):
    # Whole (small) array resident in VMEM; constant block index -> DMA'd once.
    return pl.BlockSpec(arr.shape, lambda b, _n=arr.ndim: (0,) * _n)


def mixed_mobile_convs_compact(x_nchw, params, op_choice, stride,
                               mm_dtype=MATMUL_DTYPE, images_per_step=None):
    if op_choice == 6:                                    # Identity
        return x_nchw

    K, expand_ratio = _OP_TABLE[op_choice]
    sh, sw = int(stride[0]), int(stride[1])
    add_residual = (sh, sw) == (1, 1)
    pad = K // 2
    has_expand = expand_ratio != 1

    B, Cin, H, W = x_nchw.shape
    Cmid = params["wd"].shape[1]
    Cout = params["wp"].shape[1]
    Ho = (H + 2 * pad - K) // sh + 1
    Wo = (W + 2 * pad - K) // sw + 1
    Hp = H + 2 * pad
    Wp8 = _round_up(W + 2 * pad, 8)                       # sublane-aligned scratch

    if add_residual:
        assert Cin == Cout, "residual add requires in_channels == out_channels"

    # Channels-first, spatially flattened view: a FREE reshape of NCHW.
    x = x_nchw.reshape(B, Cin, H * W)

    # Fold BN scales into the conv weights at trace time; cast the MXU weights
    # to bf16 here (not inside the kernel).  Depthwise stays f32 (VPU path).
    wdf = params["wd"] * params["sd"]                     # (K*K, Cmid)
    wpTf = (params["wp"] * params["sp"]).T.astype(mm_dtype)  # (Cout, Cmid)
    bpT = params["bp"].T                                  # (Cout, 1)

    vmem_budget = _pick_vmem_limit()
    scratch_bytes = 4 * Hp * Wp8 * Cmid
    per_image_io = 4 * (Cin * H * W + Cout * Ho * Wo)
    if images_per_step is None:
        Bt = _pick_images_per_step(B, per_image_io, scratch_bytes, vmem_budget)
    else:
        Bt = int(images_per_step)
    assert B % Bt == 0

    inputs = [x]
    in_specs = [pl.BlockSpec((Bt, Cin, H * W), lambda b: (b, 0, 0))]
    if has_expand:
        w1f = (params["w1"] * params["s1"]).astype(mm_dtype)  # (Cin, Cmid)
        inputs += [w1f, params["b1"]]
        in_specs += [_full_spec(w1f), _full_spec(params["b1"])]
    inputs += [wdf, params["bd"], wpTf, bpT]
    in_specs += [_full_spec(wdf), _full_spec(params["bd"]),
                 _full_spec(wpTf), _full_spec(bpT)]

    kern = functools.partial(
        _fused_mbconv_kernel, Bt=Bt, K=K, H=H, W=W, Ho=Ho, Wo=Wo, sh=sh, sw=sw,
        pad=pad, has_expand=has_expand, add_residual=add_residual,
        mm_dtype=mm_dtype)

    flops = 2 * B * Ho * Wo * Cmid * (K * K + Cout)
    if has_expand:
        flops += 2 * B * H * W * Cin * Cmid
    bytes_accessed = (sum(int(a.size) * a.dtype.itemsize for a in inputs)
                      + 4 * B * Ho * Wo * Cout)

    out_flat = pl.pallas_call(
        kern,
        out_shape=jax.ShapeDtypeStruct((B, Cout, Ho * Wo), jnp.float32),
        grid=(B // Bt,),
        in_specs=in_specs,
        out_specs=pl.BlockSpec((Bt, Cout, Ho * Wo), lambda b: (b, 0, 0)),
        scratch_shapes=[pltpu.VMEM((Hp, Wp8, Cmid), jnp.float32)],
        compiler_params=pltpu.CompilerParams(
            dimension_semantics=("parallel",),            # 2 TCs on v7x
            vmem_limit_bytes=vmem_budget),
        cost_estimate=pl.CostEstimate(
            flops=flops, transcendentals=0, bytes_accessed=bytes_accessed),
    )(*inputs)

    # Free reshape back to NCHW (no transpose anywhere in the wrapper).
    return out_flat.reshape(B, Cout, Ho, Wo)


# ----------------------------------------------------------------------------
# Parameter construction (deterministic, synthetic; BN in inference mode)
# ----------------------------------------------------------------------------
def _fold_bn(key, c):
    kg, kb, km, kv = jax.random.split(key, 4)
    gamma = 1.0 + 0.1 * jax.random.normal(kg, (c,), jnp.float32)
    beta = 0.1 * jax.random.normal(kb, (c,), jnp.float32)
    mean = 0.05 * jax.random.normal(km, (c,), jnp.float32)
    var = 1.0 + 0.1 * jnp.abs(jax.random.normal(kv, (c,), jnp.float32))
    scale = gamma / jnp.sqrt(var + 1e-5)
    bias = beta - mean * scale
    return scale.reshape(1, c), bias.reshape(1, c)


def make_params(key, c_in, c_out, kernel_size, expand_ratio):
    c_mid = c_in * expand_ratio
    k = kernel_size
    keys = jax.random.split(key, 6)
    params = {
        "w1": 0.1 * jax.random.normal(keys[0], (c_in, c_mid), jnp.float32),
        "wd": 0.1 * jax.random.normal(keys[1], (k * k, c_mid), jnp.float32),
        "wp": 0.1 * jax.random.normal(keys[2], (c_mid, c_out), jnp.float32),
    }
    params["s1"], params["b1"] = _fold_bn(keys[3], c_mid)
    params["sd"], params["bd"] = _fold_bn(keys[4], c_mid)
    params["sp"], params["bp"] = _fold_bn(keys[5], c_out)
    return params


# ----------------------------------------------------------------------------
# Pure-JAX reference (NCHW, mirrors the PyTorch module in eval mode)
# ----------------------------------------------------------------------------
def reference(x_nchw, params, op_choice, stride):
    if op_choice == 6:
        return x_nchw
    kernel_size, expand_ratio = _OP_TABLE[op_choice]
    downsample = tuple(stride) != (1, 1)
    K = kernel_size
    pad = K // 2

    def bn(y, s, b):
        return y * s[0][None, :, None, None] + b[0][None, :, None, None]

    h = x_nchw
    if expand_ratio != 1:
        h = jnp.einsum("bchw,co->bohw", h, params["w1"])
        h = jnp.clip(bn(h, params["s1"], params["b1"]), 0.0, 6.0)
    Cmid = h.shape[1]

    w_dw = params["wd"].reshape(K, K, Cmid).transpose(2, 0, 1)[:, None, :, :]
    d = lax.conv_general_dilated(
        h, w_dw, window_strides=tuple(stride), padding=[(pad, pad), (pad, pad)],
        feature_group_count=Cmid,
        dimension_numbers=("NCHW", "OIHW", "NCHW"))
    d = jnp.clip(bn(d, params["sd"], params["bd"]), 0.0, 6.0)

    p = jnp.einsum("bchw,co->bohw", d, params["wp"])
    p = bn(p, params["sp"], params["bp"])

    if not downsample:
        p = p + x_nchw
    return p


# ----------------------------------------------------------------------------
if __name__ == "__main__":
    B, Cin, H, W = 2, 8, 16, 16
    Cout = 8

    key = jax.random.PRNGKey(0)
    kx, kp = jax.random.split(key)
    x = jax.random.normal(kx, (B, Cin, H, W), jnp.float32)

    # Exercise k=3 / k=5, expand 1 / 3 / 6 (no-expand path included), Identity.
    configs = [(2, (1, 1)), (4, (1, 1)), (0, (1, 1)), (6, (1, 1))]

    for idx, (op_choice, stride) in enumerate(configs):
        if op_choice == 6:
            out = jax.block_until_ready(
                mixed_mobile_convs_compact(x, None, op_choice, stride))
            ref = x
        else:
            ks, er = _OP_TABLE[op_choice]
            params = make_params(jax.random.fold_in(kp, idx), Cin, Cout, ks, er)
            out = jax.block_until_ready(
                mixed_mobile_convs_compact(x, params, op_choice, stride))
            ref = reference(x, params, op_choice, stride)
        assert out.shape == ref.shape, (op_choice, out.shape, ref.shape)
        err = float(jnp.max(jnp.abs(out - ref)))
        # bf16 MXU operands (f32 accumulation): loosened tolerance vs f32 ref.
        assert jnp.allclose(out, ref, rtol=3e-2, atol=3e-2), (op_choice, err)

    print("KERNEL_OK")
</pallas_src>

<mosaic_0001>
module attributes {stable_mosaic.version = 11 : i64} {
  func.func @_fused_mbconv_kernel(%arg0: i32, %arg1: memref<1x8x256xf32, #tpu.memory_space<vmem>>, %arg2: memref<8x48xbf16, #tpu.memory_space<vmem>>, %arg3: memref<1x48xf32, #tpu.memory_space<vmem>>, %arg4: memref<9x48xf32, #tpu.memory_space<vmem>>, %arg5: memref<1x48xf32, #tpu.memory_space<vmem>>, %arg6: memref<8x48xbf16, #tpu.memory_space<vmem>>, %arg7: memref<8x1xf32, #tpu.memory_space<vmem>>, %arg8: memref<1x8x256xf32, #tpu.memory_space<vmem>>, %arg9: memref<18x24x48xf32, #tpu.memory_space<vmem>>) attributes {dimension_semantics = [#tpu.dimension_semantics<parallel>], iteration_bounds = array<i64: 2>, scalar_prefetch = 0 : i64, scratch_operands = 1 : i64, tpu.core_type = #tpu.core_type<tc>, window_params = [{transform_indices = @transform_0, window_bounds = array<i64: 1, 8, 256>}, {pipeline_mode = #tpu.pipeline_mode<synchronous>, transform_indices = @transform_1, window_bounds = array<i64: 8, 48>}, {pipeline_mode = #tpu.pipeline_mode<synchronous>, transform_indices = @transform_2, window_bounds = array<i64: 1, 48>}, {pipeline_mode = #tpu.pipeline_mode<synchronous>, transform_indices = @transform_3, window_bounds = array<i64: 9, 48>}, {pipeline_mode = #tpu.pipeline_mode<synchronous>, transform_indices = @transform_4, window_bounds = array<i64: 1, 48>}, {pipeline_mode = #tpu.pipeline_mode<synchronous>, transform_indices = @transform_5, window_bounds = array<i64: 8, 48>}, {pipeline_mode = #tpu.pipeline_mode<synchronous>, transform_indices = @transform_6, window_bounds = array<i64: 8, 1>}, {transform_indices = @transform_7, window_bounds = array<i64: 1, 8, 256>}]} {
    %cst = arith.constant 0.000000e+00 : f32
    %0 = vector.broadcast %cst : f32 to vector<1x24x48xf32>
    %c0 = arith.constant 0 : index
    %c0_0 = arith.constant 0 : index
    %c0_1 = arith.constant 0 : index
    %1 = vector.load %arg9[%c0, %c0_0, %c0_1] : memref<18x24x48xf32, #tpu.memory_space<vmem>>, vector<1x24x48xf32>
    tpu.vector_store %arg9[%c0, %c0_0, %c0_1], %0 {strides = array<i32>} : memref<18x24x48xf32, #tpu.memory_space<vmem>>, vector<1x24x48xf32>,
    %cst_2 = arith.constant 0.000000e+00 : f32
    %2 = vector.broadcast %cst_2 : f32 to vector<1x24x48xf32>
    %c17 = arith.constant 17 : index
    %c0_3 = arith.constant 0 : index
    %c0_4 = arith.constant 0 : index
    %3 = vector.load %arg9[%c17, %c0_3, %c0_4] : memref<18x24x48xf32, #tpu.memory_space<vmem>>, vector<1x24x48xf32>
    tpu.vector_store %arg9[%c17, %c0_3, %c0_4], %2 {strides = array<i32>} : memref<18x24x48xf32, #tpu.memory_space<vmem>>, vector<1x24x48xf32>,
    %cst_5 = arith.constant 0.000000e+00 : f32
    %4 = vector.broadcast %cst_5 : f32 to vector<16x1x48xf32>
    %c1 = arith.constant 1 : index
    %c0_6 = arith.constant 0 : index
    %c0_7 = arith.constant 0 : index
    %5 = vector.load %arg9[%c1, %c0_6, %c0_7] : memref<18x24x48xf32, #tpu.memory_space<vmem>>, vector<16x1x48xf32>
    tpu.vector_store %arg9[%c1, %c0_6, %c0_7], %4 {strides = array<i32>} : memref<18x24x48xf32, #tpu.memory_space<vmem>>, vector<16x1x48xf32>,
    %cst_8 = arith.constant 0.000000e+00 : f32
    %6 = vector.broadcast %cst_8 : f32 to vector<16x7x48xf32>
    %c1_9 = arith.constant 1 : index
    %c17_10 = arith.constant 17 : index
    %c0_11 = arith.constant 0 : index
    %7 = vector.load %arg9[%c1_9, %c17_10, %c0_11] : memref<18x24x48xf32, #tpu.memory_space<vmem>>, vector<16x7x48xf32>
    tpu.vector_store %arg9[%c1_9, %c17_10, %c0_11], %6 {strides = array<i32>} : memref<18x24x48xf32, #tpu.memory_space<vmem>>, vector<16x7x48xf32>,
    %c0_12 = arith.constant 0 : index
    %c0_13 = arith.constant 0 : index
    %8 = vector.load %arg4[%c0_12, %c0_13] : memref<9x48xf32, #tpu.memory_space<vmem>>, vector<9x48xf32>
    %c0_14 = arith.constant 0 : index
    %c0_15 = arith.constant 0 : index
    %c0_16 = arith.constant 0 : index
    %9 = vector.load %arg1[%c0_14, %c0_15, %c0_16] : memref<1x8x256xf32, #tpu.memory_space<vmem>>, vector<1x8x256xf32>
    %10 = vector.shape_cast %9 : vector<1x8x256xf32> to vector<8x256xf32>
    %11 = tpu.transpose %10, [1, 0] : vector<8x256xf32> -> vector<256x8xf32>
    %12 = arith.truncf %11 : vector<256x8xf32> to vector<256x8xbf16>
    %c0_17 = arith.constant 0 : index
    %c0_18 = arith.constant 0 : index
    %13 = vector.load %arg2[%c0_17, %c0_18] : memref<8x48xbf16, #tpu.memory_space<vmem>>, vector<8x48xbf16>
    %cst_19 = arith.constant dense<0.000000e+00> : vector<256x48xf32>
    %14 = tpu.matmul %12, %13, %cst_19 {dimension_numbers = #tpu.dot_dimension_numbers<[1], [0], [0], [1], [0, 0, 1, 1], [], []>} : vector<256x8xbf16>, vector<8x48xbf16>, vector<256x48xf32> -> vector<256x48xf32>
    %c0_20 = arith.constant 0 : index
    %c0_21 = arith.constant 0 : index
    %15 = vector.load %arg3[%c0_20, %c0_21] : memref<1x48xf32, #tpu.memory_space<vmem>>, vector<1x48xf32>
    %16 = vector.shape_cast %15 : vector<1x48xf32> to vector<48xf32>
    %17 = vector.shape_cast %16 : vector<48xf32> to vector<1x48xf32>
    %18 = vector.broadcast %17 : vector<1x48xf32> to vector<256x48xf32>
    %19 = arith.addf %14, %18 : vector<256x48xf32>
    %cst_22 = arith.constant 0.000000e+00 : f32
    %cst_23 = arith.constant 6.000000e+00 : f32
    %20 = vector.broadcast %cst_22 : f32 to vector<256x48xf32>
    %21 = arith.maximumf %20, %19 : vector<256x48xf32>
    %22 = vector.broadcast %cst_23 : f32 to vector<256x48xf32>
    %23 = arith.minimumf %22, %21 : vector<256x48xf32>
    %24 = vector.shape_cast %23 : vector<256x48xf32> to vector<16x16x48xf32>
    %c1_24 = arith.constant 1 : index
    %c1_25 = arith.constant 1 : index
    %c0_26 = arith.constant 0 : index
    %25 = vector.load %arg9[%c1_24, %c1_25, %c0_26] : memref<18x24x48xf32, #tpu.memory_space<vmem>>, vector<16x16x48xf32>
    tpu.vector_store %arg9[%c1_24, %c1_25, %c0_26], %24 {strides = array<i32>} : memref<18x24x48xf32, #tpu.memory_space<vmem>>, vector<16x16x48xf32>,
    %c0_27 = arith.constant 0 : index
    %c0_28 = arith.constant 0 : index
    %c0_29 = arith.constant 0 : index
    %26 = vector.load %arg9[%c0_27, %c0_28, %c0_29] : memref<18x24x48xf32, #tpu.memory_space<vmem>>, vector<16x16x48xf32>
    %27 = vector.extract_strided_slice %8 {offsets = [0, 0], sizes = [1, 48], strides = [1, 1]} : vector<9x48xf32> to vector<1x48xf32>
    %28 = vector.shape_cast %27 : vector<1x48xf32> to vector<48xf32>
    %29 = vector.shape_cast %28 : vector<48xf32> to vector<1x1x48xf32>
    %30 = vector.broadcast %29 : vector<1x1x48xf32> to vector<16x16x48xf32>
    %31 = arith.mulf %26, %30 : vector<16x16x48xf32>
    %c0_30 = arith.constant 0 : index
    %c1_31 = arith.constant 1 : index
    %c0_32 = arith.constant 0 : index
    %32 = vector.load %arg9[%c0_30, %c1_31, %c0_32] : memref<18x24x48xf32, #tpu.memory_space<vmem>>, vector<16x16x48xf32>
    %33 = vector.extract_strided_slice %8 {offsets = [1, 0], sizes = [1, 48], strides = [1, 1]} : vector<9x48xf32> to vector<1x48xf32>
    %34 = vector.shape_cast %33 : vector<1x48xf32> to vector<48xf32>
    %35 = vector.shape_cast %34 : vector<48xf32> to vector<1x1x48xf32>
    %36 = vector.broadcast %35 : vector<1x1x48xf32> to vector<16x16x48xf32>
    %37 = arith.mulf %32, %36 : vector<16x16x48xf32>
    %38 = arith.addf %31, %37 : vector<16x16x48xf32>
    %c0_33 = arith.constant 0 : index
    %c2 = arith.constant 2 : index
    %c0_34 = arith.constant 0 : index
    %39 = vector.load %arg9[%c0_33, %c2, %c0_34] : memref<18x24x48xf32, #tpu.memory_space<vmem>>, vector<16x16x48xf32>
    %40 = vector.extract_strided_slice %8 {offsets = [2, 0], sizes = [1, 48], strides = [1, 1]} : vector<9x48xf32> to vector<1x48xf32>
    %41 = vector.shape_cast %40 : vector<1x48xf32> to vector<48xf32>
    %42 = vector.shape_cast %41 : vector<48xf32> to vector<1x1x48xf32>
    %43 = vector.broadcast %42 : vector<1x1x48xf32> to vector<16x16x48xf32>
    %44 = arith.mulf %39, %43 : vector<16x16x48xf32>
    %45 = arith.addf %38, %44 : vector<16x16x48xf32>
    %c1_35 = arith.constant 1 : index
    %c0_36 = arith.constant 0 : index
    %c0_37 = arith.constant 0 : index
    %46 = vector.load %arg9[%c1_35, %c0_36, %c0_37] : memref<18x24x48xf32, #tpu.memory_space<vmem>>, vector<16x16x48xf32>
    %47 = vector.extract_strided_slice %8 {offsets = [3, 0], sizes = [1, 48], strides = [1, 1]} : vector<9x48xf32> to vector<1x48xf32>
    %48 = vector.shape_cast %47 : vector<1x48xf32> to vector<48xf32>
    %49 = vector.shape_cast %48 : vector<48xf32> to vector<1x1x48xf32>
    %50 = vector.broadcast %49 : vector<1x1x48xf32> to vector<16x16x48xf32>
    %51 = arith.mulf %46, %50 : vector<16x16x48xf32>
    %52 = arith.addf %45, %51 : vector<16x16x48xf32>
    %c1_38 = arith.constant 1 : index
    %c1_39 = arith.constant 1 : index
    %c0_40 = arith.constant 0 : index
    %53 = vector.load %arg9[%c1_38, %c1_39, %c0_40] : memref<18x24x48xf32, #tpu.memory_space<vmem>>, vector<16x16x48xf32>
    %54 = vector.extract_strided_slice %8 {offsets = [4, 0], sizes = [1, 48], strides = [1, 1]} : vector<9x48xf32> to vector<1x48xf32>
    %55 = vector.shape_cast %54 : vector<1x48xf32> to vector<48xf32>
    %56 = vector.shape_cast %55 : vector<48xf32> to vector<1x1x48xf32>
    %57 = vector.broadcast %56 : vector<1x1x48xf32> to vector<16x16x48xf32>
    %58 = arith.mulf %53, %57 : vector<16x16x48xf32>
    %59 = arith.addf %52, %58 : vector<16x16x48xf32>
    %c1_41 = arith.constant 1 : index
    %c2_42 = arith.constant 2 : index
    %c0_43 = arith.constant 0 : index
    %60 = vector.load %arg9[%c1_41, %c2_42, %c0_43] : memref<18x24x48xf32, #tpu.memory_space<vmem>>, vector<16x16x48xf32>
    %61 = vector.extract_strided_slice %8 {offsets = [5, 0], sizes = [1, 48], strides = [1, 1]} : vector<9x48xf32> to vector<1x48xf32>
    %62 = vector.shape_cast %61 : vector<1x48xf32> to vector<48xf32>
    %63 = vector.shape_cast %62 : vector<48xf32> to vector<1x1x48xf32>
    %64 = vector.broadcast %63 : vector<1x1x48xf32> to vector<16x16x48xf32>
    %65 = arith.mulf %60, %64 : vector<16x16x48xf32>
    %66 = arith.addf %59, %65 : vector<16x16x48xf32>
    %c2_44 = arith.constant 2 : index
    %c0_45 = arith.constant 0 : index
    %c0_46 = arith.constant 0 : index
    %67 = vector.load %arg9[%c2_44, %c0_45, %c0_46] : memref<18x24x48xf32, #tpu.memory_space<vmem>>, vector<16x16x48xf32>
    %68 = vector.extract_strided_slice %8 {offsets = [6, 0], sizes = [1, 48], strides = [1, 1]} : vector<9x48xf32> to vector<1x48xf32>
    %69 = vector.shape_cast %68 : vector<1x48xf32> to vector<48xf32>
    %70 = vector.shape_cast %69 : vector<48xf32> to vector<1x1x48xf32>
    %71 = vector.broadcast %70 : vector<1x1x48xf32> to vector<16x16x48xf32>
    %72 = arith.mulf %67, %71 : vector<16x16x48xf32>
    %73 = arith.addf %66, %72 : vector<16x16x48xf32>
    %c2_47 = arith.constant 2 : index
    %c1_48 = arith.constant 1 : index
    %c0_49 = arith.constant 0 : index
    %74 = vector.load %arg9[%c2_47, %c1_48, %c0_49] : memref<18x24x48xf32, #tpu.memory_space<vmem>>, vector<16x16x48xf32>
    %75 = vector.extract_strided_slice %8 {offsets = [7, 0], sizes = [1, 48], strides = [1, 1]} : vector<9x48xf32> to vector<1x48xf32>
    %76 = vector.shape_cast %75 : vector<1x48xf32> to vector<48xf32>
    %77 = vector.shape_cast %76 : vector<48xf32> to vector<1x1x48xf32>
    %78 = vector.broadcast %77 : vector<1x1x48xf32> to vector<16x16x48xf32>
    %79 = arith.mulf %74, %78 : vector<16x16x48xf32>
    %80 = arith.addf %73, %79 : vector<16x16x48xf32>
    %c2_50 = arith.constant 2 : index
    %c2_51 = arith.constant 2 : index
    %c0_52 = arith.constant 0 : index
    %81 = vector.load %arg9[%c2_50, %c2_51, %c0_52] : memref<18x24x48xf32, #tpu.memory_space<vmem>>, vector<16x16x48xf32>
    %82 = vector.extract_strided_slice %8 {offsets = [8, 0], sizes = [1, 48], strides = [1, 1]} : vector<9x48xf32> to vector<1x48xf32>
    %83 = vector.shape_cast %82 : vector<1x48xf32> to vector<48xf32>
    %84 = vector.shape_cast %83 : vector<48xf32> to vector<1x1x48xf32>
    %85 = vector.broadcast %84 : vector<1x1x48xf32> to vector<16x16x48xf32>
    %86 = arith.mulf %81, %85 : vector<16x16x48xf32>
    %87 = arith.addf %80, %86 : vector<16x16x48xf32>
    %c0_53 = arith.constant 0 : index
    %c0_54 = arith.constant 0 : index
    %88 = vector.load %arg5[%c0_53, %c0_54] : memref<1x48xf32, #tpu.memory_space<vmem>>, vector<1x48xf32>
    %89 = vector.shape_cast %88 : vector<1x48xf32> to vector<48xf32>
    %90 = vector.shape_cast %89 : vector<48xf32> to vector<1x1x48xf32>
    %91 = vector.broadcast %90 : vector<1x1x48xf32> to vector<16x16x48xf32>
    %92 = arith.addf %87, %91 : vector<16x16x48xf32>
    %cst_55 = arith.constant 0.000000e+00 : f32
    %cst_56 = arith.constant 6.000000e+00 : f32
    %93 = vector.broadcast %cst_55 : f32 to vector<16x16x48xf32>
    %94 = arith.maximumf %93, %92 : vector<16x16x48xf32>
    %95 = vector.broadcast %cst_56 : f32 to vector<16x16x48xf32>
    %96 = arith.minimumf %95, %94 : vector<16x16x48xf32>
    %97 = vector.shape_cast %96 : vector<16x16x48xf32> to vector<256x48xf32>
    %c0_57 = arith.constant 0 : index
    %c0_58 = arith.constant 0 : index
    %98 = vector.load %arg6[%c0_57, %c0_58] : memref<8x48xbf16, #tpu.memory_space<vmem>>, vector<8x48xbf16>
    %99 = arith.truncf %97 : vector<256x48xf32> to vector<256x48xbf16>
    %cst_59 = arith.constant dense<0.000000e+00> : vector<8x256xf32>
    %100 = tpu.matmul %98, %99, %cst_59 {dimension_numbers = #tpu.dot_dimension_numbers<[1], [1], [0], [0], [0, 0, 1, 0], [], []>} : vector<8x48xbf16>, vector<256x48xbf16>, vector<8x256xf32> -> vector<8x256xf32>
    %c0_60 = arith.constant 0 : index
    %c0_61 = arith.constant 0 : index
    %101 = vector.load %arg7[%c0_60, %c0_61] : memref<8x1xf32, #tpu.memory_space<vmem>>, vector<8x1xf32>
    %102 = vector.broadcast %101 : vector<8x1xf32> to vector<8x256xf32>
    %103 = arith.addf %100, %102 : vector<8x256xf32>
    %104 = arith.addf %103, %10 : vector<8x256xf32>
    %c0_62 = arith.constant 0 : index
    %c0_63 = arith.constant 0 : index
    %c0_64 = arith.constant 0 : index
    %105 = vector.load %arg8[%c0_62, %c0_63, %c0_64] : memref<1x8x256xf32, #tpu.memory_space<vmem>>, vector<1x8x256xf32>
    %106 = vector.shape_cast %105 : vector<1x8x256xf32> to vector<8x256xf32>
    %107 = vector.shape_cast %104 : vector<8x256xf32> to vector<1x8x256xf32>
    tpu.vector_store %arg8[%c0_62, %c0_63, %c0_64], %107 {strides = array<i32>} : memref<1x8x256xf32, #tpu.memory_space<vmem>>, vector<1x8x256xf32>,
    return
  }
  func.func @transform_0(%arg0: i32) -> (i32, i32, i32) {
    %c0_i32 = arith.constant 0 : i32
    %c0_i32_0 = arith.constant 0 : i32
    %c0_i32_1 = arith.constant 0 : i32
    return %arg0, %c0_i32, %c0_i32_0 : i32, i32, i32
  }
  func.func @transform_1(%arg0: i32) -> (i32, i32) {
    %c0_i32 = arith.constant 0 : i32
    %c0_i32_0 = arith.constant 0 : i32
    %c0_i32_1 = arith.constant 0 : i32
    return %c0_i32, %c0_i32_0 : i32, i32
  }
  func.func @transform_2(%arg0: i32) -> (i32, i32) {
    %c0_i32 = arith.constant 0 : i32
    %c0_i32_0 = arith.constant 0 : i32
    %c0_i32_1 = arith.constant 0 : i32
    return %c0_i32, %c0_i32_0 : i32, i32
  }
  func.func @transform_3(%arg0: i32) -> (i32, i32) {
    %c0_i32 = arith.constant 0 : i32
    %c0_i32_0 = arith.constant 0 : i32
    %c0_i32_1 = arith.constant 0 : i32
    return %c0_i32, %c0_i32_0 : i32, i32
  }
  func.func @transform_4(%arg0: i32) -> (i32, i32) {
    %c0_i32 = arith.constant 0 : i32
    %c0_i32_0 = arith.constant 0 : i32
    %c0_i32_1 = arith.constant 0 : i32
    return %c0_i32, %c0_i32_0 : i32, i32
  }
  func.func @transform_5(%arg0: i32) -> (i32, i32) {
    %c0_i32 = arith.constant 0 : i32
    %c0_i32_0 = arith.constant 0 : i32
    %c0_i32_1 = arith.constant 0 : i32
    return %c0_i32, %c0_i32_0 : i32, i32
  }
  func.func @transform_6(%arg0: i32) -> (i32, i32) {
    %c0_i32 = arith.constant 0 : i32
    %c0_i32_0 = arith.constant 0 : i32
    %c0_i32_1 = arith.constant 0 : i32
    return %c0_i32, %c0_i32_0 : i32, i32
  }
  func.func @transform_7(%arg0: i32) -> (i32, i32, i32) {
    %c0_i32 = arith.constant 0 : i32
    %c0_i32_0 = arith.constant 0 : i32
    %c0_i32_1 = arith.constant 0 : i32
    return %arg0, %c0_i32, %c0_i32_0 : i32, i32, i32
  }
}

</mosaic_0001>

<bundles_post_ra>
// kernel: tpu_custom_call.1
= control target key start
LH: loop header
LB: loop body
LE: loop exit
PB: predicated region body
PF: predicated region fallthrough
CT: control target
= control target key end

     0   :  { %12 = vsyncpa [#allocation4], 0  ;;  %s3536_s0 = inlined_call_operand.hbm [shape: f32[2,8,256], index: 0, kind: input, shape index: {}]   ;;  %s3537_s1 = inlined_call_operand.vmem [shape: bf16[8,48], index: 1, kind: input, shape index: {}]   ;;  %s3538_s2 = inlined_call_operand.hbm [shape: f32[1,48], index: 2, kind: input, shape index: {}]   ;;  %s3539_s3 = inlined_call_operand.vmem [shape: f32[9,48], index: 3, kind: input, shape index: {}]   ;;  %s3540_s4 = inlined_call_operand.hbm [shape: f32[1,48], index: 4, kind: input, shape index: {}]   ;;  %s3541_s5 = inlined_call_operand.vmem [shape: bf16[8,48], index: 5, kind: input, shape index: {}]   ;;  %s3542_s6 = inlined_call_operand.vmem [shape: f32[8,1], index: 6, kind: input, shape index: {}]   ;;  %s3543_s7 = inlined_call_operand.hbm [shape: f32[2,8,256], index: 7, kind: output, shape index: {}]  }
   0x1   :  { %14 = vsyncpa [#allocation4 + $0x1], 0 }
   0x2   :  { %15 = vsyncpa [#allocation7], 0 }
   0x3   :  { %16 = vsyncpa [#allocation5], 0 }
   0x4   :  { %18 = vsyncpa [#allocation5 + $0x1], 0  ;;  %s2360_s24 = smov 0   ;;  %s2362_s25 = smov 0  }
   0x5   :  { %s2364_s26 = smov 0   ;;  %s2366_s27 = smov 0  }
   0x6 LB: > { %s2381_s28 = sadd.s32 4294967295, %s2312_s27   ;;  %s1961_s29 = sadd.s32 4294967294, %s2312_s27   ;;  %s2312_s27 = sphi %s2366_s27, %s3595_s27   ;;  %s2308_s26 = sphi %s2364_s26, %s3594_s26   ;;  %s2304_s25 = sphi %s2362_s25, %s3593_s25   ;;  %s2300_s24 = sphi %s2360_s24, %s3592_s24  }
   0x7   : > { %p44_p0 = scmp.ne.s32.totalorder %s2304_s25, %s2300_s24  ;;  %p3544_p1 = scmp.eq.s32.totalorder %s2381_s28, 0 }
   0x8   : > { %p200_p3 = scmp.eq.s32.totalorder %s1961_s29, 1  ;;  %p1962_p5 = scmp.ge.s32.totalorder %s2312_s27, 1 }
   0x9   : > { %p2390_p4 = por %p3544_p1, %p44_p0  ;;  %p207_p7 = scmp.lt.s32.totalorder %s2312_s27, 3 }
   0xa   : > { %p2395_p6 = por %p200_p3, %p44_p0  ;;  %s2314_s10 = smov [#allocation6]  }
   0xb   : > { %s3557_s30 = scalar_select %p2390_p4, 1, 0 }
   0xc   : > { %s3558_s8 = scalar_select %p2395_p6, 1, 0 }
   0xd   : > { %p2400_p8 = pnand %p1962_p5, %p207_p7  ;;  %s223_s11 = sshll.u32 %s2314_s10, 4  ;;  %s224_s11 = int_to_ptr.vmem [resolvable:$true] %s223_s11 }
   0xe   : > { %s2315_s12 = smov [#allocation8]   ;;  %s2416_s15 = sadd.s32 1, %s2312_s27  }
   0xf   : > { %s3559_s9 = scalar_select %p2400_p8, 1, 0 }
  0x10   : > { %p2091_p10 = pneg %p2400_p8  ;;  %s237_s13 = sshll.u32 %s2315_s12, 4  ;;  %s2413_s13 = int_to_ptr.vmem [resolvable:$true] %s237_s13 }
  0x11   : > { %s28_s16 = ssub.s32 %s2312_s27, %s2416_s15  ;;  %s2156_s19 = scalar_lea.hbm %s3538_s2, 16 }
  0x12   : > { %p2409_p11 = pnand %p2091_p10, %p3544_p1  ;;  %p2157_p12 = scmp.ne.s32.totalorder %s3538_s2, %s2156_s19 }
  0x13   : > { %p2163_p5 = scmp.lt.u32.totalorder %s2156_s19, %s3538_s2 }
  0x14   : > { %p2158_p13 = pneg %p2409_p11 }
  0x16   : > { %p2159_p0 = pnand %p2158_p13, %p2157_p12 }
  0x18   : > { %p2160_p3 = pneg %p2159_p0 }
  0x1a   : > { %p2165_p7 = pnand %p2163_p5, %p2160_p3 }
  0x1c   : > { %2168 = shalt.err (!%p2165_p7)
}
  0x1d   : > { %s2169_s29 = scalar_lea.vmem %s224_s11, 16  ;;  %s2176_s10 = scalar_lea.vmem %s224_s11, 32 }
  0x1e   : > { %p2170_p10 = scmp.ne.s32.totalorder %s224_s11, %s2169_s29  ;;  %p2177_p2 = scmp.lt.s32.totalorder %s224_s11, %s224_s11 }
  0x1f   : > { %p2178_p6 = scmp.lt.s32.totalorder %s2176_s10, %s2169_s29 }
  0x20   : > { %p2172_p9 = pnand %p2170_p10, %p2158_p13 }
  0x21   : > { %p2179_p4 = por %p2178_p6, %p2177_p2 }
  0x22   : > { %p2173_p1 = pneg %p2172_p9 }
  0x24   : > { %p2180_p8 = pnand %p2179_p4, %p2173_p1 }
  0x26   : > { %2183 = shalt.err (!%p2180_p8)
}
  0x27   : > { %2094 = dma.hbm_to_vmem [thread:$0]  (!%p2409_p11), %s3538_s2, 16, %s224_s11, [#allocation7]  }
  0x28   : > { %s2184_s20 = scalar_lea.hbm %s3540_s4, 16 }
  0x29   : > { %p2185_p9 = scmp.ne.s32.totalorder %s3540_s4, %s2184_s20  ;;  %p2191_p4 = scmp.lt.u32.totalorder %s2184_s20, %s3540_s4 }
  0x2b   : > { %p2187_p2 = pnand %p2185_p9, %p2158_p13 }
  0x2d   : > { %p2188_p1 = pneg %p2187_p2 }
  0x2f   : > { %p2193_p6 = pnand %p2191_p4, %p2188_p1 }
  0x31   : > { %2196 = shalt.err (!%p2193_p6)
}
  0x32   : > { %s2197_s11 = scalar_lea.vmem %s2413_s13, 16  ;;  %s2204_s10 = scalar_lea.vmem %s2413_s13, 32 }
  0x33   : > { %p2198_p8 = scmp.ne.s32.totalorder %s2413_s13, %s2197_s11  ;;  %p2205_p3 = scmp.lt.s32.totalorder %s2413_s13, %s2413_s13 }
  0x34   : > { %p2206_p5 = scmp.lt.s32.totalorder %s2204_s10, %s2197_s11 }
  0x35   : > { %p2200_p12 = pnand %p2198_p8, %p2158_p13 }
  0x36   : > { %p2207_p7 = por %p2206_p5, %p2205_p3 }
  0x37   : > { %p2201_p0 = pneg %p2200_p12 }
  0x39   : > { %p2208_p10 = pnand %p2207_p7, %p2201_p0 }
  0x3b   : > { %2211 = shalt.err (!%p2208_p10)
}
  0x3c   : > { %2097 = dma.hbm_to_vmem [thread:$0]  (!%p2409_p11), %s3540_s4, 16, %s2413_s13, [#allocation7]  }
  0x3d   : > { %p29_p13 = scmp.eq.s32.totalorder %s28_s16, 0  ;;  %s31_s18 = sadd.s32 1, %s2308_s26 }
  0x3e   : > { %p38_p9 = scmp.ne.s32.totalorder %s2308_s26, %s2304_s25  ;;  %p39_p2 = scmp.eq.s32.totalorder %s2312_s27, 0 }
  0x3f   : > { %s2476_s14 = scalar_select %p29_p13, %s2308_s26, %s31_s18  }
  0x40   : > { %p40_p1 = por %p39_p2, %p38_p9  ;;  %p3561_p4 = scmp.eq.s32.totalorder %s2381_s28, 1 }
  0x41   : > { %p2108_p8 = scmp.lt.s32.totalorder %s2312_s27, 2  ;;  %s254_s20 = sand.u32 1, %s2308_s26  }
  0x42   : > { %p2480_p6 = por %p3561_p4, %p38_p9  ;;  %s1966_s21 = sshll.u32 %s254_s20, 4 }
  0x43   : > { %s1999_s22 = sshll.u32 %s2312_s27, 8  ;;  %s258_s16 = scalar_lea.vmem [#allocation3], %s1966_s21 }
  0x44   : > { %s2490_s13 = scalar_lea.hbm %s3536_s0, %s1999_s22  ;;  %s266_s11 = sshll.u32 %s258_s16, 4  ;;  %s2492_s11 = int_to_ptr.vmem [resolvable:$true] %s266_s11 }
  0x45   : > { %p2494_p11 = pnand %p2108_p8, %p40_p1  ;;  %s255_s12 = scalar_lea.sflag [#allocation4], %s254_s20 }
  0x46   : > { %s2212_s17 = scalar_lea.hbm %s2490_s13, 256  ;;  %s2217_s22 = scalar_lea.hbm %s3536_s0, 512 }
  0x47   : > { %p2213_p12 = scmp.ne.s32.totalorder %s2490_s13, %s2212_s17  ;;  %p2214_p0 = pneg %p2494_p11 }
  0x48   : > { %p2218_p7 = scmp.lt.u32.totalorder %s2490_s13, %s3536_s0  ;;  %p2219_p10 = scmp.lt.u32.totalorder %s2217_s22, %s2212_s17 }
  0x49   : > { %p2215_p3 = pnand %p2214_p0, %p2213_p12  ;;  %p2221_p9 = scmp.lt.u32.totalorder %s2212_s17, %s2490_s13 }
  0x4a   : > { %p2220_p13 = por %p2219_p10, %p2218_p7 }
  0x4b   : > { %p2216_p5 = pneg %p2215_p3 }
  0x4c   : > { %p2222_p2 = por %p2221_p9, %p2220_p13 }
  0x4e   : > { %p2223_p1 = pnand %p2222_p2, %p2216_p5 }
  0x50   : > { %2226 = shalt.err (!%p2223_p1)
}
  0x51   : > { %s2227_s20 = scalar_lea.vmem %s2492_s11, 256  ;;  %s2316_s16 = smov [#allocation3]  }
  0x52   : > { %p2228_p4 = scmp.ne.s32.totalorder %s2492_s11, %s2227_s20  ;;  %s2232_s18 = sshll.u32 %s2316_s16, 4  ;;  %s2233_s18 = int_to_ptr.vmem [resolvable:$false] %s2232_s18 }
  0x53   : > { %s2234_s21 = scalar_lea.vmem %s2233_s18, 512  ;;  %p2235_p3 = scmp.lt.s32.totalorder %s2492_s11, %s2233_s18 }
  0x54   : > { %p2230_p8 = pnand %p2228_p4, %p2214_p0  ;;  %p2236_p7 = scmp.lt.s32.totalorder %s2234_s21, %s2227_s20 }
  0x56   : > { %p2231_p12 = pneg %p2230_p8  ;;  %p2237_p10 = por %p2236_p7, %p2235_p3 }
  0x58   : > { %p2238_p13 = pnand %p2237_p10, %p2231_p12 }
  0x5a   : > { %2241 = shalt.err (!%p2238_p13)
}
  0x5b   : > { %2101 = dma.hbm_to_vmem [thread:$0]  (!%p2494_p11), %s2490_s13, 256, %s2492_s11, %s255_s12  }
  0x5c   : > { %p3564_p5 = scmp.ne.s32.totalorder %s3559_s9, 0 }
  0x5e   : > { %275 = sbr.rel (%p3564_p5) target bundleno = 915 (0x393), region = 48 }
  0x65   : > { %s2526_s17 = sand.u32 1, %s2304_s25   ;;  %p3565_p0 = scmp.ne.s32.totalorder %s3557_s30, 0 }
  0x66   : > { %s1970_s22 = sshll.u32 %s2526_s17, 4  ;;  %s278_s23 = scalar_lea.sflag [#allocation4], %s2526_s17 }
  0x67   : > { %s2532_s29 = scalar_lea.vmem [#allocation3], %s1970_s22 }
  0x68   : > { %2287 = dma.done.wait (%p3565_p0), %s278_s23, 256  }
  0x69   : > { %2289 = vsyncadd (%p3565_p0), %s278_s23, 4294967040  ;;  %p3566_p11 = scmp.eq.s32.totalorder %s2381_s28, 0 }
  0x6b   : > { %2291 = dma.done.wait (%p3566_p11), [#allocation7], 32   ;;  %p3567_p9 = pmov %p3566_p11 }
  0x6c   : > { %v366_v0 = vld [vmem:[%s2532_s29] sm:$0xff]  ;;  %vm505_vm0 = vcmask 1043456   ;;  %v367_v3 = vld [vmem:[%s2532_s29 + $0x8] sm:$0xff]  ;;  %vm456_vm1 = vcmask 64512   ;;  %vm321_vm2 = vcmask 392192   ;;  %v2317_v43 = vmov 0.0  }
  0x6d   : > { %2293 = vsyncadd (%p3567_p9), [#allocation7], 4294967264  ;;  %368 = vxpose.xlu0.b32.start.end [1/1] (short) %v366_v0, 128  ;;  %v448_v1 = vld [vmem:[%s3537_s1] sm:$0xf]  ;;  %322 = vst.msk [vmem:[#allocation2] sm:$0xff] %vm321_vm2, %v2317_v43  ;;  %vm330_vm3 = vcmask 385024   ;;  %v798_v53 = vlaneseq }
  0x6e   : > { %2070 = vmatprep.subr.msk.bf16.mxu0 %vm505_vm0, %v448_v1  ;;  %v507_v2 = vsel %vm505_vm0, %v448_v1, 0  ;;  %323 = vst.msk [vmem:[#allocation2 + $0x8] sm:$0xff] %vm321_vm2, %v2317_v43  ;;  %324 = vst.msk [vmem:[#allocation2 + $0x10] sm:$0xff] %vm321_vm2, %v2317_v43  ;;  %vm347_vm4 = vcmask 391168   ;;  %v2601_v57 = vld [vmem:[#allocation6] ss:$0 sm:$0xff] }
  0x6f   : > { %2037 = vmatpush3.bf16.msra.mxu0 %v507_v2  ;;  %326 = vst.msk [vmem:[#allocation2 + $0x198] sm:$0xff] %vm321_vm2, %v2317_v43  ;;  %327 = vst.msk [vmem:[#allocation2 + $0x1a0] sm:$0xff] %vm321_vm2, %v2317_v43  ;;  %v799_v54 = vshrl.u32 %v798_v53, 7  ;;  %v364_v58 = vld [vmem:[%s3539_s3] sm:$0xff]  ;;  %s2000_s11 = sshll.u32 %s2381_s28, 8  ;;  %s319_s10 = scalar_lea.vmem [#allocation9], %s1970_s22 }
  0x70   : > { %328 = vst.msk [vmem:[#allocation2 + $0x1a8] sm:$0xff] %vm321_vm2, %v2317_v43  ;;  %s1872_s12 = sshll.u32 %s319_s10, 4  ;;  %s3492_s18 = scalar_lea.hbm %s3543_s7, %s2000_s11  ;;  %s3494_s12 = int_to_ptr.vmem [resolvable:$true] %s1872_s12 }
  0x71   : > { %338 = vst.msk [vmem:[#allocation2 + $0xc0] sm:$0x1] %vm330_vm3, %v2317_v43  ;;  %339 = vst.msk [vmem:[#allocation2 + $0xd8] sm:$0x1] %vm330_vm3, %v2317_v43  ;;  %v800_v55 = vsub.s32 0, %v799_v54  ;;  %v868_v56 = vsub.s32 1, %v799_v54 }
  0x72   : > { %340 = vst.msk [vmem:[#allocation2 + $0xf0] sm:$0x1] %vm330_vm3, %v2317_v43  ;;  %331 = vst.msk [vmem:[#allocation2 + $0x18] sm:$0x1] %vm330_vm3, %v2317_v43  ;;  %v968_v60 = vsub.s32 2, %v799_v54  ;;  %s1858_s28 = scalar_lea.sflag [#allocation5], %s2526_s17 }
  0x73   : > { %332 = vst.msk [vmem:[#allocation2 + $0x30] sm:$0x1] %vm330_vm3, %v2317_v43  ;;  %333 = vst.msk [vmem:[#allocation2 + $0x48] sm:$0x1] %vm330_vm3, %v2317_v43  ;;  %v2607_v63 = vrot.slane %v364_v58, %v800_v55  ;;  %v2609_v0 = vrot.slane %v364_v58, %v868_v56  ;;  %s2242_s22 = scalar_lea.vmem %s3494_s12, 256 }
  0x74   : > { %334 = vst.msk [vmem:[#allocation2 + $0x60] sm:$0x1] %vm330_vm3, %v2317_v43  ;;  %335 = vst.msk [vmem:[#allocation2 + $0x78] sm:$0x1] %vm330_vm3, %v2317_v43  ;;  %p2243_p2 = scmp.ne.s32.totalorder %s3494_s12, %s2242_s22 }
  0x75   : > { %336 = vst.msk [vmem:[#allocation2 + $0x90] sm:$0x1] %vm330_vm3, %v2317_v43  ;;  %337 = vst.msk [vmem:[#allocation2 + $0xa8] sm:$0x1] %vm330_vm3, %v2317_v43 }
  0x76   : > { %341 = vst.msk [vmem:[#allocation2 + $0x108] sm:$0x1] %vm330_vm3, %v2317_v43  ;;  %342 = vst.msk [vmem:[#allocation2 + $0x120] sm:$0x1] %vm330_vm3, %v2317_v43  ;;  %p2244_p1 = pnand %p2243_p2, %p2480_p6 }
  0x77   : > { %343 = vst.msk [vmem:[#allocation2 + $0x138] sm:$0x1] %vm330_vm3, %v2317_v43  ;;  %344 = vst.msk [vmem:[#allocation2 + $0x150] sm:$0x1] %vm330_vm3, %v2317_v43 }
  0x78   : > { %345 = vst.msk [vmem:[#allocation2 + $0x168] sm:$0x1] %vm330_vm3, %v2317_v43  ;;  %346 = vst.msk [vmem:[#allocation2 + $0x180] sm:$0x1] %vm330_vm3, %v2317_v43  ;;  %p2245_p4 = pneg %p2244_p1 }
  0x79   : > { %355 = vst.msk [vmem:[#allocation2 + $0xd1] sm:$0x7f] %vm347_vm4, %v2317_v43  ;;  %356 = vst.msk [vmem:[#allocation2 + $0xe9] sm:$0x7f] %vm347_vm4, %v2317_v43 }
  0x7a   : > { %357 = vst.msk [vmem:[#allocation2 + $0x101] sm:$0x7f] %vm347_vm4, %v2317_v43  ;;  %348 = vst.msk [vmem:[#allocation2 + $0x29] sm:$0x7f] %vm347_vm4, %v2317_v43 }
  0x7b   : > { %349 = vst.msk [vmem:[#allocation2 + $0x41] sm:$0x7f] %vm347_vm4, %v2317_v43  ;;  %350 = vst.msk [vmem:[#allocation2 + $0x59] sm:$0x7f] %vm347_vm4, %v2317_v43 }
  0x7c   : > { %351 = vst.msk [vmem:[#allocation2 + $0x71] sm:$0x7f] %vm347_vm4, %v2317_v43  ;;  %352 = vst.msk [vmem:[#allocation2 + $0x89] sm:$0x7f] %vm347_vm4, %v2317_v43 }
  0x7d   : > { %353 = vst.msk [vmem:[#allocation2 + $0xa1] sm:$0x7f] %vm347_vm4, %v2317_v43  ;;  %354 = vst.msk [vmem:[#allocation2 + $0xb9] sm:$0x7f] %vm347_vm4, %v2317_v43 }
  0x7e   : > { %358 = vst.msk [vmem:[#allocation2 + $0x119] sm:$0x7f] %vm347_vm4, %v2317_v43  ;;  %359 = vst.msk [vmem:[#allocation2 + $0x131] sm:$0x7f] %vm347_vm4, %v2317_v43 }
  0x7f   : > { %360 = vst.msk [vmem:[#allocation2 + $0x149] sm:$0x7f] %vm347_vm4, %v2317_v43  ;;  %361 = vst.msk [vmem:[#allocation2 + $0x161] sm:$0x7f] %vm347_vm4, %v2317_v43 }
  0x80   : > { %362 = vst.msk [vmem:[#allocation2 + $0x179] sm:$0x7f] %vm347_vm4, %v2317_v43  ;;  %363 = vst.msk [vmem:[#allocation2 + $0x191] sm:$0x7f] %vm347_vm4, %v2317_v43 }
  0xaa   : > { %400 = vxpose.xlu0.b32.start.end [1/1] (short) %v367_v3, 128  ;;  %v766_v3 = vld [vmem:[#allocation2] sm:$0xff] }
  0xed   : > { %v384_v4 = vpop.trf.xlu0 }
  0xf1   : > { %v385_v5 = vpop.trf.xlu0 }
  0xf2   : > { %v432_v6 = vpack.c.bf16 %v385_v5, %v384_v4  ;;  %v834_v4 = vld [vmem:[#allocation2 + $0x1] sm:$0xff] }
  0xf4   : > { %2038 = vmatprep.mubr.msk.bf16.mxu0 %vm456_vm1, %v432_v6 }
  0xf5   : > { %v386_v7 = vpop.trf.xlu0 }
  0xf9   : > { %v387_v8 = vpop.trf.xlu0 }
  0xfa   : > { %v433_v9 = vpack.c.bf16 %v387_v8, %v386_v7  ;;  %v767_v8 = vld [vmem:[#allocation2 + $0x8] sm:$0xff] }
  0xfc   : > { %2039 = vmatmul.mubr.msk.bf16.vlgmr.msra.gmra.mrb[0].mxu0 %vm456_vm1, %v433_v9  ;;  %v835_v9 = vld [vmem:[#allocation2 + $0x9] sm:$0xff] }
  0xfd   : > { %v388_v10 = vpop.trf.xlu0 }
 0x101   : > { %v389_v11 = vpop.trf.xlu0 }
 0x102   : > { %v434_v12 = vpack.c.bf16 %v389_v11, %v388_v10 }
 0x104   : > { %2042 = vmatprep.mubr.msk.bf16.mxu0 %vm456_vm1, %v434_v12  ;;  %v2614_v12 = vrot.slane %v364_v58, %v968_v60 }
 0x105   : > { %v390_v13 = vpop.trf.xlu0 }
 0x109   : > { %v391_v14 = vpop.trf.xlu0 }
 0x10a   : > { %v435_v15 = vpack.c.bf16 %v391_v14, %v390_v13  ;;  %v1068_v13 = vsub.s32 3, %v799_v54 }
 0x10c   : > { %2043 = vmatmul.mubr.msk.bf16.gmra.mrb[4].mxu0 %vm456_vm1, %v435_v15 }
 0x10d   : > { %v392_v16 = vpop.trf.xlu0 }
 0x111   : > { %v393_v17 = vpop.trf.xlu0 }
 0x112   : > { %v436_v18 = vpack.c.bf16 %v393_v17, %v392_v16  ;;  %v802_v16 = vmul.f32 %v2607_v63, %v766_v3  ;;  %v870_v17 = vmul.f32 %v2609_v0, %v834_v4 }
 0x114   : > { %2046 = vmatprep.mubr.msk.bf16.mxu0 %vm456_vm1, %v436_v18 }
 0x115   : > { %v394_v19 = vpop.trf.xlu0 }
 0x119   : > { %v395_v20 = vpop.trf.xlu0 }
 0x11a   : > { %v437_v21 = vpack.c.bf16 %v395_v20, %v394_v19  ;;  %v803_v20 = vmul.f32 %v2607_v63, %v767_v8 }
 0x11c   : > { %2047 = vmatmul.mubr.msk.bf16.gmra.mrb[8].mxu0 %vm456_vm1, %v437_v21  ;;  %v871_v21 = vmul.f32 %v2609_v0, %v835_v9 }
 0x11d   : > { %v396_v22 = vpop.trf.xlu0 }
 0x121   : > { %v397_v23 = vpop.trf.xlu0 }
 0x122   : > { %v438_v24 = vpack.c.bf16 %v397_v23, %v396_v22  ;;  %v1168_v23 = vsub.s32 4, %v799_v54 }
 0x124   : > { %2050 = vmatprep.mubr.msk.bf16.mxu0 %vm456_vm1, %v438_v24  ;;  %v1369_v24 = vsub.s32 6, %v799_v54 }
 0x125   : > { %v398_v25 = vpop.trf.xlu0 }
 0x129   : > { %v399_v26 = vpop.trf.xlu0 }
 0x12a   : > { %v439_v27 = vpack.c.bf16 %v399_v26, %v398_v25  ;;  %v1469_v25 = vsub.s32 7, %v799_v54  ;;  %v934_v26 = vld [vmem:[#allocation2 + $0x2] sm:$0xff] }
 0x12c   : > { %2051 = vmatmul.mubr.msk.bf16.gmra.mrb[12].mxu0 %vm456_vm1, %v439_v27  ;;  %v935_v27 = vld [vmem:[#allocation2 + $0xa] sm:$0xff] }
 0x12d   : > { %v416_v28 = vpop.trf.xlu0 }
 0x131   : > { %v417_v29 = vpop.trf.xlu0 }
 0x132   : > { %v440_v30 = vpack.c.bf16 %v417_v29, %v416_v28  ;;  %v1268_v29 = vsub.s32 5, %v799_v54 }
 0x134   : > { %2054 = vmatprep.mubr.msk.bf16.mxu0 %vm456_vm1, %v440_v30  ;;  %v902_v30 = vadd.f32 %v870_v17, %v802_v16 }
 0x135   : > { %v418_v31 = vpop.trf.xlu0 }
 0x139   : > { %v419_v32 = vpop.trf.xlu0 }
 0x13a   : > { %v441_v33 = vpack.c.bf16 %v419_v32, %v418_v31  ;;  %v903_v31 = vadd.f32 %v871_v21, %v803_v20  ;;  %v970_v32 = vmul.f32 %v2614_v12, %v934_v26 }
 0x13c   : > { %2055 = vmatmul.mubr.msk.bf16.gmra.mrb[16].mxu0 %vm456_vm1, %v441_v33  ;;  %v971_v33 = vmul.f32 %v2614_v12, %v935_v27 }
 0x13d   : > { %v420_v34 = vpop.trf.xlu0 }
 0x141   : > { %v421_v35 = vpop.trf.xlu0 }
 0x142   : > { %v442_v36 = vpack.c.bf16 %v421_v35, %v420_v34  ;;  %v2626_v34 = vrot.slane %v364_v58, %v1068_v13  ;;  %v2628_v35 = vrot.slane %v364_v58, %v1168_v23 }
 0x144   : > { %2058 = vmatprep.mubr.msk.bf16.mxu0 %vm456_vm1, %v442_v36  ;;  %v2630_v36 = vrot.slane %v364_v58, %v1369_v24 }
 0x145   : > { %v422_v37 = vpop.trf.xlu0 }
 0x149   : > { %v423_v38 = vpop.trf.xlu0 }
 0x14a   : > { %v443_v39 = vpack.c.bf16 %v423_v38, %v422_v37  ;;  %v2632_v37 = vrot.slane %v364_v58, %v1469_v25  ;;  %v2637_v38 = vld [vmem:[%s3539_s3 + $0x8] ss:$0 sm:$0xff] }
 0x14c   : > { %2059 = vmatmul.mubr.msk.bf16.gmra.mrb[20].mxu0 %vm456_vm1, %v443_v39  ;;  %v2639_v39 = vrot.slane %v364_v58, %v1268_v29 }
 0x14d   : > { %v424_v40 = vpop.trf.xlu0 }
 0x151   : > { %v425_v41 = vpop.trf.xlu0 }
 0x152   : > { %v444_v42 = vpack.c.bf16 %v425_v41, %v424_v40  ;;  %v1002_v40 = vadd.f32 %v970_v32, %v902_v30  ;;  %v1003_v41 = vadd.f32 %v971_v33, %v903_v31 }
 0x154   : > { %2062 = vmatprep.mubr.msk.bf16.mxu0 %vm456_vm1, %v444_v42 }
 0x155   : > { %v426_v44 = vpop.trf.xlu0 }
 0x159   : > { %v427_v45 = vpop.trf.xlu0 }
 0x15a   : > { %v445_v46 = vpack.c.bf16 %v427_v45, %v426_v44 }
 0x15c   : > { %2063 = vmatmul.mubr.msk.bf16.gmra.mrb[24].mxu0 %vm456_vm1, %v445_v46 }
 0x15d   : > { %v428_v47 = vpop.trf.xlu0 }
 0x161   : > { %v429_v48 = vpop.trf.xlu0 }
 0x162   : > { %v446_v49 = vpack.c.bf16 %v429_v48, %v428_v47 }
 0x164   : > { %2066 = vmatprep.mubr.msk.bf16.mxu0 %vm456_vm1, %v446_v49 }
 0x165   : > { %v430_v50 = vpop.trf.xlu0 }
 0x169   : > { %v431_v51 = vpop.trf.xlu0 }
 0x16a   : > { %v447_v52 = vpack.c.bf16 %v431_v51, %v430_v50 }
 0x16c   : > { %2067 = vmatmul.mubr.msk.bf16.gmra.mrb[28].mxu0 %vm456_vm1, %v447_v52 }
 0x1cf   : > { %v2040_v59 = vpop.f32.mrb[0].mxu0 }
 0x1d0   : > { %v552_v61 = vadd.f32 %v2040_v59, %v2601_v57  ;;  %v543_v62 = vpop.f32.mrb[1].mxu0 }
 0x1d1   : > { %v544_v1 = vadd.f32 %v2601_v57, %v543_v62  ;;  %v2041_v2 = vpop.f32.mrb[2].mxu0 }
 0x1d2   : > { %v672_v5 = vmax.f32 %v552_v61, 0.0  ;;  %v555_v6 = vadd.f32 %v2041_v2, %v2601_v57  ;;  %v546_v7 = vpop.f32.mrb[3].mxu0 }
 0x1d3   : > { %v670_v10 = vmax.f32 %v544_v1, 0.0  ;;  %v547_v11 = vadd.f32 %v2601_v57, %v546_v7 }
 0x1d4   : > { %v704_v14 = vmin.f32 %v672_v5, 6.0  ;;  %v673_v15 = vmax.f32 %v555_v6, 0.0 }
 0x1d5   : > { %v702_v18 = vmin.f32 %v670_v10, 6.0  ;;  %v671_v19 = vmax.f32 %v547_v11, 0.0 }
 0x1d6   : > { %736 = vst.msk [vmem:[#allocation2 + $0x31] sm:$0xff] %vm321_vm2, %v704_v14  ;;  %v705_v22 = vmin.f32 %v673_v15, 6.0 }
 0x1d7   : > { %734 = vst.msk [vmem:[#allocation2 + $0x19] sm:$0xff] %vm321_vm2, %v702_v18  ;;  %v703_v28 = vmin.f32 %v671_v19, 6.0 }
 0x1d8   : > { %737 = vst.msk [vmem:[#allocation2 + $0x39] sm:$0xff] %vm321_vm2, %v705_v22 }
 0x1d9   : > { %735 = vst.msk [vmem:[#allocation2 + $0x21] sm:$0xff] %vm321_vm2, %v703_v28 }
 0x1dd   : > { %v2641_v42 = vld [vmem:[#allocation2 + $0x30] sm:$0xff] }
 0x1de   : > { %v2643_v43 = vld [vmem:[#allocation2 + $0x31] sm:$0xff]  ;;  %v1134_v45 = vld [vmem:[#allocation2 + $0x19] sm:$0xff]  ;;  %v1371_v46 = vmul.f32 %v2630_v36, %v2641_v42  ;;  %v2651_v48 = vmul.f32 %v2641_v42, %v2626_v34 }
 0x1df   : > { %v1034_v44 = vld [vmem:[#allocation2 + $0x18] sm:$0xff]  ;;  %v1471_v47 = vmul.f32 %v2632_v37, %v2643_v43  ;;  %v2655_v49 = vmul.f32 %v2643_v43, %v2628_v35  ;;  %v2044_v50 = vpop.f32.mrb[4].mxu0  ;;  %v1170_v52 = vmul.f32 %v2628_v35, %v1134_v45  ;;  %v872_v58 = vmul.f32 %v1134_v45, %v2609_v0 }
 0x1e0   : > { %v1070_v51 = vmul.f32 %v2626_v34, %v1034_v44  ;;  %v1336_v53 = vld [vmem:[#allocation2 + $0x38] sm:$0xff]  ;;  %v804_v56 = vmul.f32 %v1034_v44, %v2607_v63  ;;  %v568_v59 = vadd.f32 %v2044_v50, %v2601_v57  ;;  %v559_v60 = vpop.f32.mrb[5].mxu0  ;;  %v1035_v61 = vld [vmem:[#allocation2 + $0x20] sm:$0xff] }
 0x1e1   : > { %v2659_v54 = vld [vmem:[#allocation2 + $0x39] sm:$0xff]  ;;  %v1135_v62 = vld [vmem:[#allocation2 + $0x21] sm:$0xff]  ;;  %v1372_v2 = vmul.f32 %v2630_v36, %v1336_v53  ;;  %v560_v5 = vadd.f32 %v2601_v57, %v559_v60  ;;  %v2045_v6 = vpop.f32.mrb[6].mxu0  ;;  %v1071_v7 = vmul.f32 %v2626_v34, %v1035_v61  ;;  %v805_v25 = vmul.f32 %v1035_v61, %v2607_v63  ;;  %v2693_v61 = vld [vmem:[#allocation8] ss:$0 sm:$0xff] }
 0x1e2   : > { %v2661_v55 = vld [vmem:[#allocation2 + $0x32] sm:$0xff]  ;;  %v1234_v1 = vld [vmem:[#allocation2 + $0x1a] sm:$0xff]  ;;  %v1472_v3 = vmul.f32 %v2632_v37, %v2659_v54  ;;  %v1102_v8 = vadd.f32 %v1070_v51, %v1002_v40  ;;  %v1171_v9 = vmul.f32 %v2628_v35, %v1135_v62  ;;  %v1235_v10 = vld [vmem:[#allocation2 + $0x22] sm:$0xff]  ;;  %v676_v13 = vmax.f32 %v568_v59, 0.0  ;;  %v562_v15 = vpop.f32.mrb[7].mxu0 }
 0x1e3   : > { %v1571_v4 = vmul.f32 %v2637_v38, %v2661_v55  ;;  %v1536_v11 = vld [vmem:[#allocation2 + $0x3a] sm:$0xff]  ;;  %v571_v14 = vadd.f32 %v2045_v6, %v2601_v57  ;;  %v1270_v16 = vmul.f32 %v2639_v39, %v1234_v1  ;;  %v1271_v17 = vmul.f32 %v2639_v39, %v1235_v10 }
 0x1e4   : > { %v674_v18 = vmax.f32 %v560_v5, 0.0  ;;  %v563_v19 = vadd.f32 %v2601_v57, %v562_v15  ;;  %v1103_v20 = vadd.f32 %v1071_v7, %v1003_v41  ;;  %v1202_v21 = vadd.f32 %v1170_v52, %v1102_v8 }
 0x1e5   : > { %v708_v22 = vmin.f32 %v676_v13, 6.0  ;;  %v677_v23 = vmax.f32 %v571_v14, 0.0  ;;  %v1572_v24 = vmul.f32 %v2637_v38, %v1536_v11  ;;  %v873_v31 = vmul.f32 %v1135_v62, %v2609_v0 }
 0x1e6   : > { %v706_v26 = vmin.f32 %v674_v18, 6.0  ;;  %v675_v27 = vmax.f32 %v563_v19, 0.0  ;;  %v1203_v28 = vadd.f32 %v1171_v9, %v1103_v20  ;;  %v1302_v29 = vadd.f32 %v1270_v16, %v1202_v21 }
 0x1e7   : > { %740 = vst.msk [vmem:[#allocation2 + $0x61] sm:$0xff] %vm321_vm2, %v708_v22  ;;  %v709_v30 = vmin.f32 %v677_v23, 6.0  ;;  %v904_v32 = vadd.f32 %v872_v58, %v804_v56  ;;  %v972_v33 = vmul.f32 %v1234_v1, %v2614_v12  ;;  %v973_v45 = vmul.f32 %v1235_v10, %v2614_v12 }
 0x1e8   : > { %738 = vst.msk [vmem:[#allocation2 + $0x49] sm:$0xff] %vm321_vm2, %v706_v26  ;;  %v707_v40 = vmin.f32 %v675_v27, 6.0  ;;  %v1303_v41 = vadd.f32 %v1271_v17, %v1203_v28  ;;  %v1403_v44 = vadd.f32 %v1371_v46, %v1302_v29  ;;  %v905_v50 = vadd.f32 %v873_v31, %v805_v25 }
 0x1e9   : > { %741 = vst.msk [vmem:[#allocation2 + $0x69] sm:$0xff] %vm321_vm2, %v709_v30  ;;  %v1004_v51 = vadd.f32 %v972_v33, %v904_v32  ;;  %v1073_v52 = vmul.f32 %v1336_v53, %v2626_v34  ;;  %v1173_v59 = vmul.f32 %v2659_v54, %v2628_v35  ;;  %v1272_v60 = vmul.f32 %v2661_v55, %v2639_v39 }
 0x1ea   : > { %739 = vst.msk [vmem:[#allocation2 + $0x51] sm:$0xff] %vm321_vm2, %v707_v40  ;;  %v1404_v56 = vadd.f32 %v1372_v2, %v1303_v41  ;;  %v1503_v58 = vadd.f32 %v1471_v47, %v1403_v44  ;;  %v1273_v46 = vmul.f32 %v1536_v11, %v2639_v39  ;;  %v1005_v62 = vadd.f32 %v973_v45, %v905_v50 }
 0x1eb   : > { %v1104_v1 = vadd.f32 %v2651_v48, %v1004_v51  ;;  %v806_v5 = vmul.f32 %v2641_v42, %v2607_v63  ;;  %v807_v6 = vmul.f32 %v1336_v53, %v2607_v63  ;;  %v874_v47 = vmul.f32 %v2643_v43, %v2609_v0 }
 0x1ec   : > { %v1504_v7 = vadd.f32 %v1472_v3, %v1404_v56  ;;  %v1603_v8 = vadd.f32 %v1571_v4, %v1503_v58  ;;  %v875_v2 = vmul.f32 %v2659_v54, %v2609_v0  ;;  %v1105_v9 = vadd.f32 %v1073_v52, %v1005_v62 }
 0x1ed   : > { %v1204_v10 = vadd.f32 %v2655_v49, %v1104_v1  ;;  %v974_v13 = vmul.f32 %v2661_v55, %v2614_v12  ;;  %v975_v48 = vmul.f32 %v1536_v11, %v2614_v12  ;;  %v906_v53 = vadd.f32 %v874_v47, %v806_v5 }
 0x1ee   : > { %v1604_v14 = vadd.f32 %v1572_v24, %v1504_v7  ;;  %v1642_v42 = vadd.f32 %v2693_v61, %v1603_v8  ;;  %v907_v3 = vadd.f32 %v875_v2, %v807_v6  ;;  %v2708_v4 = vld [vmem:[#allocation2 + $0x60] sm:$0xff]  ;;  %v1205_v43 = vadd.f32 %v1173_v59, %v1105_v9 }
 0x1ef   : > { %v2710_v15 = vld [vmem:[#allocation2 + $0x61] sm:$0xff]  ;;  %v1304_v16 = vadd.f32 %v1272_v60, %v1204_v10  ;;  %v2714_v17 = vld [vmem:[#allocation2 + $0x49] sm:$0xff]  ;;  %v2718_v49 = vmul.f32 %v2630_v36, %v2708_v4  ;;  %v2048_v11 = vpop.f32.mrb[8].mxu0  ;;  %v1006_v27 = vadd.f32 %v974_v13, %v906_v53 }
 0x1f0   : > { %v2712_v54 = vld [vmem:[#allocation2 + $0x48] sm:$0xff]  ;;  %v2722_v55 = vmul.f32 %v2632_v37, %v2710_v15  ;;  %v1643_v18 = vadd.f32 %v2693_v61, %v1604_v14  ;;  %v1674_v19 = vmax.f32 %v1642_v42, 0.0  ;;  %v1473_v21 = vmul.f32 %v2632_v37, %v2714_v17  ;;  %v575_v23 = vpop.f32.mrb[9].mxu0 }
 0x1f1   : > { %v1373_v20 = vmul.f32 %v2630_v36, %v2712_v54  ;;  %v584_v22 = vadd.f32 %v2048_v11, %v2601_v57  ;;  %v1305_v24 = vadd.f32 %v1273_v46, %v1205_v43  ;;  %v2730_v25 = vld [vmem:[#allocation2 + $0x50] sm:$0xff]  ;;  %v1007_v28 = vadd.f32 %v975_v48, %v907_v3  ;;  %v2049_v30 = vpop.f32.mrb[10].mxu0  ;;  %v2746_v48 = vld [vmem:[#allocation2 + $0x68] sm:$0xff] }
 0x1f2   : > { %v2732_v26 = vld [vmem:[#allocation2 + $0x51] sm:$0xff]  ;;  %v576_v29 = vadd.f32 %v2601_v57, %v575_v23  ;;  %v1675_v31 = vmax.f32 %v1643_v18, 0.0  ;;  %v1706_v32 = vmin.f32 %v1674_v19, 6.0  ;;  %v1374_v33 = vmul.f32 %v2630_v36, %v2730_v25  ;;  %v578_v45 = vpop.f32.mrb[11].mxu0  ;;  %v2756_v43 = vld [vmem:[#allocation2 + $0x69] sm:$0xff] }
 0x1f3   : > { %v1537_v40 = vld [vmem:[#allocation2 + $0x4a] sm:$0xff]  ;;  %v680_v41 = vmax.f32 %v584_v22, 0.0  ;;  %v587_v44 = vadd.f32 %v2049_v30, %v2601_v57  ;;  %v1405_v50 = vadd.f32 %v1373_v20, %v1304_v16  ;;  %v1474_v51 = vmul.f32 %v2632_v37, %v2732_v26  ;;  %v1538_v60 = vld [vmem:[#allocation2 + $0x52] sm:$0xff]  ;;  %v2762_v20 = vld [vmem:[#allocation2 + $0x62] sm:$0xff] }
 0x1f4   : > { %v678_v52 = vmax.f32 %v576_v29, 0.0  ;;  %v579_v59 = vadd.f32 %v2601_v57, %v578_v45  ;;  %v1707_v56 = vmin.f32 %v1675_v31, 6.0  ;;  %v1406_v58 = vadd.f32 %v1374_v33, %v1305_v24 }
 0x1f5   : > { %v712_v46 = vmin.f32 %v680_v41, 6.0  ;;  %v681_v62 = vmax.f32 %v587_v44, 0.0  ;;  %v1505_v1 = vadd.f32 %v1473_v21, %v1405_v50  ;;  %v1573_v5 = vmul.f32 %v2637_v38, %v1537_v40  ;;  %v2764_v21 = vld [vmem:[#allocation2 + $0x6a] sm:$0xff] }
 0x1f6   : > { %v710_v6 = vmin.f32 %v678_v52, 6.0  ;;  %v679_v7 = vmax.f32 %v579_v59, 0.0  ;;  %v1739_v8 = vpack.c.bf16 %v1707_v56, %v1706_v32  ;;  %v1506_v47 = vadd.f32 %v1474_v51, %v1406_v58 }
 0x1f7   : > { %744 = vst.msk [vmem:[#allocation2 + $0x91] sm:$0xff] %vm321_vm2, %v712_v46  ;;  %v713_v2 = vmin.f32 %v681_v62, 6.0  ;;  %v1574_v9 = vmul.f32 %v2637_v38, %v1538_v60  ;;  %v1605_v10 = vadd.f32 %v1573_v5, %v1505_v1  ;;  %v1074_v13 = vmul.f32 %v2712_v54, %v2626_v34 }
 0x1f8   : > { %742 = vst.msk [vmem:[#allocation2 + $0x79] sm:$0xff] %vm321_vm2, %v710_v6  ;;  %v711_v14 = vmin.f32 %v679_v7, 6.0  ;;  %v2750_v42 = vsel %vm321_vm2, %v1739_v8, 0  ;;  %v1075_v53 = vmul.f32 %v2730_v25, %v2626_v34  ;;  %v1174_v3 = vmul.f32 %v2714_v17, %v2628_v35 }
 0x1f9   : > { %745 = vst.msk [vmem:[#allocation2 + $0x99] sm:$0xff] %vm321_vm2, %v713_v2  ;;  %v1606_v16 = vadd.f32 %v1574_v9, %v1506_v47  ;;  %v1644_v11 = vadd.f32 %v2693_v61, %v1605_v10  ;;  %v1106_v18 = vadd.f32 %v1074_v13, %v1006_v27  ;;  %v1175_v19 = vmul.f32 %v2732_v26, %v2628_v35 }
 0x1fa   : > { %743 = vst.msk [vmem:[#allocation2 + $0x81] sm:$0xff] %vm321_vm2, %v711_v14  ;;  %v1107_v22 = vadd.f32 %v1075_v53, %v1007_v28  ;;  %v1274_v23 = vmul.f32 %v1537_v40, %v2639_v39  ;;  %v1275_v24 = vmul.f32 %v1538_v60, %v2639_v39  ;;  %v1376_v29 = vmul.f32 %v2630_v36, %v2746_v48 }
 0x1fb   : > { %v1645_v30 = vadd.f32 %v2693_v61, %v1606_v16  ;;  %v1676_v27 = vmax.f32 %v1644_v11, 0.0  ;;  %v1206_v31 = vadd.f32 %v1174_v3, %v1106_v18  ;;  %v1476_v32 = vmul.f32 %v2632_v37, %v2756_v43 }
 0x1fc   : > { %v1207_v33 = vadd.f32 %v1175_v19, %v1107_v22  ;;  %v1575_v41 = vmul.f32 %v2637_v38, %v2762_v20  ;;  %v1576_v28 = vmul.f32 %v2637_v38, %v2764_v21  ;;  %v808_v44 = vmul.f32 %v2712_v54, %v2607_v63 }
 0x1fd   : > { %v1677_v45 = vmax.f32 %v1645_v30, 0.0  ;;  %v1708_v50 = vmin.f32 %v1676_v27, 6.0  ;;  %v1306_v51 = vadd.f32 %v1274_v23, %v1206_v31  ;;  %v809_v52 = vmul.f32 %v2730_v25, %v2607_v63 }
 0x1fe   : > { %v1307_v59 = vadd.f32 %v1275_v24, %v1207_v33  ;;  %v876_v56 = vmul.f32 %v2714_v17, %v2609_v0  ;;  %v877_v58 = vmul.f32 %v2732_v26, %v2609_v0  ;;  %v976_v46 = vmul.f32 %v1537_v40, %v2614_v12 }
 0x1ff   : > { %v1709_v62 = vmin.f32 %v1677_v45, 6.0  ;;  %v1407_v1 = vadd.f32 %v2718_v49, %v1306_v51  ;;  %v977_v54 = vmul.f32 %v1538_v60, %v2614_v12  ;;  %v1076_v5 = vmul.f32 %v2708_v4, %v2626_v34  ;;  %v2052_v6 = vpop.f32.mrb[12].mxu0  ;;  %v2807_v45 = vld [vmem:[#allocation2 + $0x78] sm:$0xff] }
 0x200   : > { %v1408_v7 = vadd.f32 %v1376_v29, %v1307_v59  ;;  %v908_v25 = vadd.f32 %v876_v56, %v808_v44  ;;  %v909_v8 = vadd.f32 %v877_v58, %v809_v52  ;;  %v1077_v17 = vmul.f32 %v2746_v48, %v2626_v34  ;;  %v591_v26 = vpop.f32.mrb[13].mxu0  ;;  %v2814_v59 = vld [vmem:[#allocation2 + $0x79] sm:$0xff] }
 0x201   : > { %v600_v47 = vadd.f32 %v2052_v6, %v2601_v57  ;;  %v1740_v2 = vpack.c.bf16 %v1709_v62, %v1708_v50  ;;  %v1507_v40 = vadd.f32 %v2722_v55, %v1407_v1  ;;  %v1176_v49 = vmul.f32 %v2710_v15, %v2628_v35  ;;  %v2053_v9 = vpop.f32.mrb[14].mxu0  ;;  %v2816_v56 = vld [vmem:[#allocation2 + $0x81] sm:$0xff] }
 0x202   : > { %v592_v60 = vadd.f32 %v2601_v57, %v591_v26  ;;  %v1508_v10 = vadd.f32 %v1476_v32, %v1408_v7  ;;  %v1008_v13 = vadd.f32 %v976_v46, %v908_v25  ;;  %v1009_v14 = vadd.f32 %v977_v54, %v909_v8  ;;  %v594_v16 = vpop.f32.mrb[15].mxu0  ;;  %v2821_v54 = vld [vmem:[#allocation2 + $0x7a] sm:$0xff] }
 0x203   : > { %v684_v53 = vmax.f32 %v600_v47, 0.0  ;;  %v603_v3 = vadd.f32 %v2053_v9, %v2601_v57  ;;  %v2800_v11 = vsel %vm321_vm2, %v1740_v2, 0  ;;  %v1607_v18 = vadd.f32 %v1575_v41, %v1507_v40  ;;  %v2809_v41 = vld [vmem:[#allocation2 + $0x80] sm:$0xff] }
 0x204   : > { %v682_v19 = vmax.f32 %v592_v60, 0.0  ;;  %v595_v55 = vadd.f32 %v2601_v57, %v594_v16  ;;  %v1608_v22 = vadd.f32 %v1576_v28, %v1508_v10  ;;  %v1108_v23 = vadd.f32 %v1076_v5, %v1008_v13  ;;  %v2823_v5 = vld [vmem:[#allocation2 + $0x82] sm:$0xff] }
 0x205   : > { %v716_v24 = vmin.f32 %v684_v53, 6.0  ;;  %v685_v29 = vmax.f32 %v603_v3, 0.0  ;;  %v1646_v30 = vadd.f32 %v2693_v61, %v1607_v18  ;;  %v1109_v27 = vadd.f32 %v1077_v17, %v1009_v14 }
 0x206   : > { %v714_v31 = vmin.f32 %v682_v19, 6.0  ;;  %v683_v32 = vmax.f32 %v595_v55, 0.0  ;;  %v1647_v33 = vadd.f32 %v2693_v61, %v1608_v22  ;;  %v1177_v44 = vmul.f32 %v2756_v43, %v2628_v35 }
 0x207   : > { %748 = vst.msk [vmem:[#allocation2 + $0xc1] sm:$0xff] %vm321_vm2, %v716_v24  ;;  %v717_v28 = vmin.f32 %v685_v29, 6.0  ;;  %v1678_v50 = vmax.f32 %v1646_v30, 0.0  ;;  %v1208_v51 = vadd.f32 %v1176_v49, %v1108_v23  ;;  %v1276_v52 = vmul.f32 %v2762_v20, %v2639_v39 }
 0x208   : > { %746 = vst.msk [vmem:[#allocation2 + $0xa9] sm:$0xff] %vm321_vm2, %v714_v31  ;;  %v715_v58 = vmin.f32 %v683_v32, 6.0  ;;  %v1679_v46 = vmax.f32 %v1647_v33, 0.0  ;;  %v1209_v62 = vadd.f32 %v1177_v44, %v1109_v27  ;;  %v1277_v1 = vmul.f32 %v2764_v21, %v2639_v39 }
 0x209   : > { %749 = vst.msk [vmem:[#allocation2 + $0xc9] sm:$0xff] %vm321_vm2, %v717_v28  ;;  %v1710_v6 = vmin.f32 %v1678_v50, 6.0  ;;  %v1308_v7 = vadd.f32 %v1276_v52, %v1208_v51  ;;  %v1377_v25 = vmul.f32 %v2630_v36, %v2807_v45  ;;  %v1378_v8 = vmul.f32 %v2630_v36, %v2809_v41 }
 0x20a   : > { %747 = vst.msk [vmem:[#allocation2 + $0xb1] sm:$0xff] %vm321_vm2, %v715_v58  ;;  %v1711_v17 = vmin.f32 %v1679_v46, 6.0  ;;  %v1309_v47 = vadd.f32 %v1277_v1, %v1209_v62  ;;  %v1477_v26 = vmul.f32 %v2632_v37, %v2814_v59  ;;  %v1478_v2 = vmul.f32 %v2632_v37, %v2816_v56 }
 0x20b   : > { %v1409_v40 = vadd.f32 %v1377_v25, %v1308_v7  ;;  %v1577_v49 = vmul.f32 %v2637_v38, %v2821_v54  ;;  %v1578_v60 = vmul.f32 %v2637_v38, %v2823_v5  ;;  %v810_v9 = vmul.f32 %v2708_v4, %v2607_v63 }
 0x20c   : > { %v1741_v10 = vpack.c.bf16 %v1711_v17, %v1710_v6  ;;  %v1410_v13 = vadd.f32 %v1378_v8, %v1309_v47  ;;  %v811_v14 = vmul.f32 %v2746_v48, %v2607_v63  ;;  %v878_v53 = vmul.f32 %v2710_v15, %v2609_v0 }
 0x20d   : > { %v1509_v3 = vadd.f32 %v1477_v26, %v1409_v40  ;;  %v879_v16 = vmul.f32 %v2756_v43, %v2609_v0  ;;  %v978_v18 = vmul.f32 %v2762_v20, %v2614_v12  ;;  %v979_v19 = vmul.f32 %v2764_v21, %v2614_v12 }
 0x20e   : > { %v782_v55 = vld [vmem:[#allocation2 + $0xc0] sm:$0xff]  ;;  %v2852_v22 = vsel %vm321_vm2, %v1741_v10, 0  ;;  %v1510_v23 = vadd.f32 %v1478_v2, %v1410_v13  ;;  %v910_v48 = vadd.f32 %v878_v53, %v810_v9  ;;  %v1078_v15 = vmul.f32 %v2807_v45, %v2626_v34 }
 0x20f   : > { %v850_v4 = vld [vmem:[#allocation2 + $0xc1] sm:$0xff]  ;;  %v818_v24 = vmul.f32 %v2607_v63, %v782_v55  ;;  %v1609_v29 = vadd.f32 %v1577_v49, %v1509_v3  ;;  %v911_v30 = vadd.f32 %v879_v16, %v811_v14  ;;  %v2056_v20 = vpop.f32.mrb[16].mxu0  ;;  %v1079_v44 = vmul.f32 %v2809_v41, %v2626_v34 }
 0x210   : > { %v886_v43 = vmul.f32 %v2609_v0, %v850_v4  ;;  %v783_v27 = vld [vmem:[#allocation2 + $0xc8] sm:$0xff]  ;;  %v1610_v32 = vadd.f32 %v1578_v60, %v1510_v23  ;;  %v1010_v33 = vadd.f32 %v978_v18, %v910_v48  ;;  %v1178_v28 = vmul.f32 %v2814_v59, %v2628_v35  ;;  %v607_v51 = vpop.f32.mrb[17].mxu0  ;;  %v2876_v23 = vld [vmem:[#allocation2 + $0x90] sm:$0xff]  ;;  %v2878_v48 = vld [vmem:[#allocation2 + $0x98] sm:$0xff] }
 0x211   : > { %v851_v31 = vld [vmem:[#allocation2 + $0xc9] sm:$0xff]  ;;  %v616_v50 = vadd.f32 %v2056_v20, %v2601_v57  ;;  %v819_v52 = vmul.f32 %v2607_v63, %v783_v27  ;;  %v608_v1 = vadd.f32 %v2601_v57, %v607_v51  ;;  %v2057_v6 = vpop.f32.mrb[18].mxu0  ;;  %v1648_v8 = vadd.f32 %v2693_v61, %v1609_v29  ;;  %3568 = vst [vmem:[#allocation13_spill] sm:$0xff] %v2876_v23  ;;  %v2883_v27 = vld [vmem:[#allocation2 + $0x91] sm:$0xff] }
 0x212   : > { %v950_v21 = vld [vmem:[#allocation2 + $0xc2] sm:$0xff]  ;;  %v887_v58 = vmul.f32 %v2609_v0, %v851_v31  ;;  %v918_v46 = vadd.f32 %v886_v43, %v818_v24  ;;  %v951_v62 = vld [vmem:[#allocation2 + $0xca] sm:$0xff]  ;;  %v619_v47 = vadd.f32 %v2057_v6, %v2601_v57  ;;  %v610_v26 = vpop.f32.mrb[19].mxu0  ;;  %v1649_v40 = vadd.f32 %v2693_v61, %v1610_v32  ;;  %3569 = vst [vmem:[#allocation14_spill] sm:$0xff] %v2878_v48  ;;  %v2885_v31 = vld [vmem:[#allocation2 + $0x99] sm:$0xff] }
 0x213   : > { %v986_v7 = vmul.f32 %v2614_v12, %v950_v21  ;;  %v987_v25 = vmul.f32 %v2614_v12, %v951_v62  ;;  %v688_v17 = vmax.f32 %v616_v50, 0.0  ;;  %v686_v49 = vmax.f32 %v608_v1, 0.0  ;;  %3570 = vst [vmem:[#allocation15_spill] sm:$0xff] %v2883_v27  ;;  %3571 = vst [vmem:[#allocation16_spill] sm:$0xff] %v2885_v31  ;;  %v2887_v21 = vld [vmem:[#allocation2 + $0x92] sm:$0xff] }
 0x214   : > { %v919_v2 = vadd.f32 %v887_v58, %v819_v52  ;;  %v611_v60 = vadd.f32 %v2601_v57, %v610_v26  ;;  %v1680_v10 = vmax.f32 %v1648_v8, 0.0  ;;  %v689_v14 = vmax.f32 %v619_v47, 0.0  ;;  %3572 = vst [vmem:[#allocation17_spill] sm:$0xff] %v2887_v21 }
 0x215   : > { %v2872_v9 = vadd.f32 %v986_v7, %v918_v46  ;;  %v720_v13 = vmin.f32 %v688_v17, 6.0  ;;  %v1681_v3 = vmax.f32 %v1649_v40, 0.0  ;;  %v718_v16 = vmin.f32 %v686_v49, 6.0 }
 0x216   : > { %v2874_v53 = vadd.f32 %v987_v25, %v919_v2  ;;  %v687_v18 = vmax.f32 %v611_v60, 0.0  ;;  %v1712_v55 = vmin.f32 %v1680_v10, 6.0  ;;  %v1011_v4 = vadd.f32 %v979_v19, %v911_v30 }
 0x217   : > { %752 = vst.msk [vmem:[#allocation2 + $0xf1] sm:$0xff] %vm321_vm2, %v720_v13  ;;  %v721_v24 = vmin.f32 %v689_v14, 6.0  ;;  %v1713_v43 = vmin.f32 %v1681_v3, 6.0  ;;  %v1110_v29 = vadd.f32 %v1078_v15, %v1010_v33  ;;  %v1179_v20 = vmul.f32 %v2816_v56, %v2628_v35  ;;  %750 = vst.msk [vmem:[#allocation2 + $0xd9] sm:$0xff] %vm321_vm2, %v718_v16  ;;  %v2894_v15 = vld [vmem:[#allocation2 + $0x9a] sm:$0xff] }
 0x218   : > { %v719_v19 = vmin.f32 %v687_v18, 6.0  ;;  %v1111_v30 = vadd.f32 %v1079_v44, %v1011_v4  ;;  %v1278_v32 = vmul.f32 %v2821_v54, %v2639_v39  ;;  %v1279_v50 = vmul.f32 %v2823_v5, %v2639_v39  ;;  %3573 = vst [vmem:[#allocation18_spill] sm:$0xff] %v2894_v15 }
 0x219   : > { %753 = vst.msk [vmem:[#allocation2 + $0xf9] sm:$0xff] %vm321_vm2, %v721_v24  ;;  %v1742_v33 = vpack.c.bf16 %v1713_v43, %v1712_v55  ;;  %v1210_v51 = vadd.f32 %v1178_v28, %v1110_v29  ;;  %v1379_v52 = vmul.f32 %v2630_v36, %v2876_v23  ;;  %v1380_v58 = vmul.f32 %v2630_v36, %v2878_v48 }
 0x21a   : > { %751 = vst.msk [vmem:[#allocation2 + $0xe1] sm:$0xff] %vm321_vm2, %v719_v19  ;;  %v1211_v44 = vadd.f32 %v1179_v20, %v1111_v30  ;;  %v2904_v46 = vmul.f32 %v2632_v37, %v2883_v27  ;;  %v2908_v62 = vmul.f32 %v2632_v37, %v2885_v31  ;;  %v2912_v28 = vmul.f32 %v2637_v38, %v2887_v21 }
 0x21b   : > { %v2915_v1 = vsel %vm321_vm2, %v1742_v33, 0  ;;  %v1310_v6 = vadd.f32 %v1278_v32, %v1210_v51  ;;  %v2919_v7 = vmul.f32 %v2637_v38, %v2894_v15  ;;  %v812_v25 = vmul.f32 %v2807_v45, %v2607_v63 }
 0x21c   : > { %v1311_v8 = vadd.f32 %v1279_v50, %v1211_v44  ;;  %v813_v17 = vmul.f32 %v2809_v41, %v2607_v63  ;;  %v880_v47 = vmul.f32 %v2814_v59, %v2609_v0  ;;  %v881_v26 = vmul.f32 %v2816_v56, %v2609_v0 }
 0x21d   : > { %v2929_v2 = vadd.f32 %v1379_v52, %v1310_v6  ;;  %v2933_v40 = vmul.f32 %v2821_v54, %v2614_v12  ;;  %v2937_v49 = vmul.f32 %v2823_v5, %v2614_v12  ;;  %v2941_v45 = vmul.f32 %v2876_v23, %v2626_v34 }
 0x21e   : > { %v2943_v41 = vld [vmem:[#allocation2 + $0xf0] sm:$0xff]  ;;  %v2947_v60 = vadd.f32 %v1380_v58, %v1311_v8  ;;  %v2949_v56 = vadd.f32 %v880_v47, %v812_v25  ;;  %v2951_v10 = vadd.f32 %v881_v26, %v813_v17  ;;  %v2955_v54 = vmul.f32 %v2878_v48, %v2626_v34  ;;  %v1050_v5 = vld [vmem:[#allocation2 + $0xd8] sm:$0xff] }
 0x21f   : > { %3574 = vst [vmem:[#allocation19_spill] sm:$0xff] %v2933_v40  ;;  %3575 = vst [vmem:[#allocation20_spill] sm:$0xff] %v2937_v49  ;;  %v2945_v59 = vld [vmem:[#allocation2 + $0xf1] sm:$0xff]  ;;  %v1150_v13 = vld [vmem:[#allocation2 + $0xd9] sm:$0xff]  ;;  %v1387_v14 = vmul.f32 %v2630_v36, %v2943_v41  ;;  %v2963_v16 = vmul.f32 %v2943_v41, %v2626_v34  ;;  %v2060_v55 = vpop.f32.mrb[20].mxu0  ;;  %v1086_v4 = vmul.f32 %v2626_v34, %v1050_v5 }
 0x220   : > { %3576 = vst [vmem:[#allocation21_spill] sm:$0xff] %v2941_v45  ;;  %3577 = vst [vmem:[#allocation22_spill] sm:$0xff] %v2951_v10  ;;  %v1487_v3 = vmul.f32 %v2632_v37, %v2945_v59  ;;  %v2967_v18 = vmul.f32 %v2945_v59, %v2628_v35  ;;  %v1186_v24 = vmul.f32 %v2628_v35, %v1150_v13  ;;  %v1352_v43 = vld [vmem:[#allocation2 + $0xf8] sm:$0xff]  ;;  %v623_v50 = vpop.f32.mrb[21].mxu0 }
 0x221   : > { %3578 = vst [vmem:[#allocation23_spill] sm:$0xff] %v2955_v54  ;;  %v2971_v29 = vld [vmem:[#allocation2 + $0xf9] sm:$0xff]  ;;  %v820_v19 = vmul.f32 %v1050_v5, %v2607_v63  ;;  %v888_v30 = vmul.f32 %v1150_v13, %v2609_v0  ;;  %v632_v32 = vadd.f32 %v2060_v55, %v2601_v57  ;;  %v1151_v51 = vld [vmem:[#allocation2 + $0xe1] sm:$0xff]  ;;  %v1388_v58 = vmul.f32 %v2630_v36, %v1352_v43  ;;  %v2061_v8 = vpop.f32.mrb[22].mxu0 }
 0x222   : > { %v2973_v20 = vld [vmem:[#allocation2 + $0xf2] sm:$0xff]  ;;  %v1051_v33 = vld [vmem:[#allocation2 + $0xe0] sm:$0xff]  ;;  %v1488_v44 = vmul.f32 %v2632_v37, %v2971_v29  ;;  %v624_v25 = vadd.f32 %v2601_v57, %v623_v50  ;;  %v1118_v47 = vadd.f32 %v1086_v4, %v2872_v9  ;;  %v1187_v26 = vmul.f32 %v2628_v35, %v1151_v51  ;;  %v626_v23 = vpop.f32.mrb[23].mxu0 }
 0x223   : > { %v1250_v52 = vld [vmem:[#allocation2 + $0xda] sm:$0xff]  ;;  %v1587_v6 = vmul.f32 %v2637_v38, %v2973_v20  ;;  %v1087_v17 = vmul.f32 %v2626_v34, %v1051_v33  ;;  %v1251_v5 = vld [vmem:[#allocation2 + $0xe2] sm:$0xff]  ;;  %v692_v55 = vmax.f32 %v632_v32, 0.0  ;;  %v635_v48 = vadd.f32 %v2061_v8, %v2601_v57 }
 0x224   : > { %v1552_v13 = vld [vmem:[#allocation2 + $0xfa] sm:$0xff]  ;;  %v1286_v15 = vmul.f32 %v2639_v39, %v1250_v52  ;;  %v1287_v54 = vmul.f32 %v2639_v39, %v1251_v5  ;;  %v690_v21 = vmax.f32 %v624_v25, 0.0  ;;  %v627_v50 = vadd.f32 %v2601_v57, %v626_v23 }
 0x225   : > { %v1119_v45 = vadd.f32 %v1087_v17, %v2874_v53  ;;  %v1218_v31 = vadd.f32 %v1186_v24, %v1118_v47  ;;  %v1738_v9 = vld [vmem:[%s3541_s5] sm:$0xf]  ;;  %v724_v4 = vmin.f32 %v692_v55, 6.0  ;;  %v693_v27 = vmax.f32 %v635_v48, 0.0 }
 0x226   : > { %v1588_v32 = vmul.f32 %v2637_v38, %v1552_v13  ;;  %v821_v8 = vmul.f32 %v1051_v33, %v2607_v63  ;;  %2034 = vmatprep.mubr.msk.bf16.mxu1 %vm321_vm2, %v1738_v9  ;;  %v722_v49 = vmin.f32 %v690_v21, 6.0  ;;  %v691_v10 = vmax.f32 %v627_v50, 0.0 }
 0x227   : > { %v1219_v25 = vadd.f32 %v1187_v26, %v1119_v45  ;;  %v1318_v40 = vadd.f32 %v1286_v15, %v1218_v31  ;;  %756 = vst.msk [vmem:[#allocation2 + $0x121] sm:$0xff] %vm321_vm2, %v724_v4  ;;  %v725_v53 = vmin.f32 %v693_v27, 6.0  ;;  %v889_v23 = vmul.f32 %v1151_v51, %v2609_v0 }
 0x228   : > { %v920_v24 = vadd.f32 %v888_v30, %v820_v19  ;;  %v988_v17 = vmul.f32 %v1250_v52, %v2614_v12  ;;  %754 = vst.msk [vmem:[#allocation2 + $0x109] sm:$0xff] %vm321_vm2, %v722_v49  ;;  %v723_v48 = vmin.f32 %v691_v10, 6.0  ;;  %v989_v33 = vmul.f32 %v1251_v5, %v2614_v12 }
 0x229   : > { %v1319_v47 = vadd.f32 %v1287_v54, %v1219_v25  ;;  %v1419_v55 = vadd.f32 %v1387_v14, %v1318_v40  ;;  %757 = vst.msk [vmem:[#allocation2 + $0x129] sm:$0xff] %vm321_vm2, %v725_v53  ;;  %v921_v21 = vadd.f32 %v889_v23, %v821_v8  ;;  %v1089_v31 = vmul.f32 %v1352_v43, %v2626_v34 }
 0x22a   : > { %v1020_v45 = vadd.f32 %v988_v17, %v920_v24  ;;  %v1189_v27 = vmul.f32 %v2971_v29, %v2628_v35  ;;  %755 = vst.msk [vmem:[#allocation2 + $0x111] sm:$0xff] %vm321_vm2, %v723_v48  ;;  %v1288_v49 = vmul.f32 %v2973_v20, %v2639_v39  ;;  %v1289_v40 = vmul.f32 %v1552_v13, %v2639_v39 }
 0x22b   : > { %v1420_v15 = vadd.f32 %v1388_v58, %v1319_v47  ;;  %v1519_v19 = vadd.f32 %v1487_v3, %v1419_v55  ;;  %v1021_v10 = vadd.f32 %v989_v33, %v921_v21  ;;  %v822_v14 = vmul.f32 %v2943_v41, %v2607_v63 }
 0x22c   : > { %v1120_v54 = vadd.f32 %v2963_v16, %v1020_v45  ;;  %v823_v30 = vmul.f32 %v1352_v43, %v2607_v63  ;;  %v890_v26 = vmul.f32 %v2945_v59, %v2609_v0  ;;  %v891_v3 = vmul.f32 %v2971_v29, %v2609_v0 }
 0x22d   : > { %v1520_v51 = vadd.f32 %v1488_v44, %v1420_v15  ;;  %v1619_v52 = vadd.f32 %v1587_v6, %v1519_v19  ;;  %v1121_v58 = vadd.f32 %v1089_v31, %v1021_v10  ;;  %v990_v50 = vmul.f32 %v2973_v20, %v2614_v12 }
 0x22e   : > { %v1220_v5 = vadd.f32 %v2967_v18, %v1120_v54  ;;  %v991_v16 = vmul.f32 %v1552_v13, %v2614_v12  ;;  %v922_v43 = vadd.f32 %v890_v26, %v822_v14  ;;  %v923_v44 = vadd.f32 %v891_v3, %v823_v30  ;;  %v3024_v6 = vld [vmem:[#allocation2 + $0x120] sm:$0xff] }
 0x22f   : > { %v1620_v9 = vadd.f32 %v1588_v32, %v1520_v51  ;;  %v1658_v41 = vadd.f32 %v2693_v61, %v1619_v52  ;;  %v3026_v4 = vld [vmem:[#allocation2 + $0x121] sm:$0xff]  ;;  %v1221_v59 = vadd.f32 %v1189_v27, %v1121_v58  ;;  %v3030_v25 = vld [vmem:[#allocation2 + $0x109] sm:$0xff]  ;;  %v3034_v18 = vmul.f32 %v2630_v36, %v3024_v6  ;;  %v2064_v13 = vpop.f32.mrb[24].mxu0 }
 0x230   : > { %v1320_v8 = vadd.f32 %v1288_v49, %v1220_v5  ;;  %v3028_v29 = vld [vmem:[#allocation2 + $0x108] sm:$0xff]  ;;  %v3038_v20 = vmul.f32 %v2632_v37, %v3026_v4  ;;  %v1489_v24 = vmul.f32 %v2632_v37, %v3030_v25  ;;  %v648_v17 = vadd.f32 %v2064_v13, %v2601_v57  ;;  %v639_v48 = vpop.f32.mrb[25].mxu0 }
 0x231   : > { %v1659_v32 = vadd.f32 %v2693_v61, %v1620_v9  ;;  %v1690_v53 = vmax.f32 %v1658_v41, 0.0  ;;  %v1389_v23 = vmul.f32 %v2630_v36, %v3028_v29  ;;  %v1321_v47 = vadd.f32 %v1289_v40, %v1221_v59  ;;  %v1354_v55 = vld [vmem:[#allocation2 + $0x110] sm:$0xff]  ;;  %v2065_v27 = vpop.f32.mrb[26].mxu0 }
 0x232   : > { %v3046_v33 = vld [vmem:[#allocation2 + $0x111] sm:$0xff]  ;;  %v1022_v21 = vadd.f32 %v990_v50, %v922_v43  ;;  %v1023_v45 = vadd.f32 %v991_v16, %v923_v44  ;;  %v640_v31 = vadd.f32 %v2601_v57, %v639_v48  ;;  %v1390_v49 = vmul.f32 %v2630_v36, %v1354_v55  ;;  %v642_v30 = vpop.f32.mrb[27].mxu0 }
 0x233   : > { %v1691_v15 = vmax.f32 %v1659_v32, 0.0  ;;  %v1722_v19 = vmin.f32 %v1690_v53, 6.0  ;;  %v1553_v10 = vld [vmem:[#allocation2 + $0x10a] sm:$0xff]  ;;  %v696_v54 = vmax.f32 %v648_v17, 0.0  ;;  %v651_v14 = vadd.f32 %v2065_v27, %v2601_v57  ;;  %v1554_v5 = vld [vmem:[#allocation2 + $0x112] sm:$0xff]  ;;  %v3070_v27 = vld [vmem:[#allocation2 + $0x122] sm:$0xff] }
 0x234   : > { %v1421_v51 = vadd.f32 %v1389_v23, %v1320_v8  ;;  %v1490_v40 = vmul.f32 %v2632_v37, %v3046_v33  ;;  %v694_v52 = vmax.f32 %v640_v31, 0.0  ;;  %v643_v26 = vadd.f32 %v2601_v57, %v642_v30  ;;  %v3059_v23 = vld [vmem:[#allocation2 + $0x128] sm:$0xff] }
 0x235   : > { %v1723_v3 = vmin.f32 %v1691_v15, 6.0  ;;  %v1422_v58 = vadd.f32 %v1390_v49, %v1321_v47  ;;  %v728_v50 = vmin.f32 %v696_v54, 6.0  ;;  %v697_v16 = vmax.f32 %v651_v14, 0.0  ;;  %v3061_v17 = vld [vmem:[#allocation2 + $0x129] sm:$0xff] }
 0x236   : > { %v1521_v9 = vadd.f32 %v1489_v24, %v1421_v51  ;;  %v1589_v41 = vmul.f32 %v2637_v38, %v1553_v10  ;;  %v726_v43 = vmin.f32 %v694_v52, 6.0  ;;  %v695_v44 = vmax.f32 %v643_v26, 0.0  ;;  %v3076_v14 = vld [vmem:[#allocation2 + $0x12a] sm:$0xff] }
 0x237   : > { %v1747_v59 = vpack.c.bf16 %v1723_v3, %v1722_v19  ;;  %v1522_v13 = vadd.f32 %v1490_v40, %v1422_v58  ;;  %760 = vst.msk [vmem:[#allocation2 + $0x151] sm:$0xff] %vm321_vm2, %v728_v50  ;;  %v729_v8 = vmin.f32 %v697_v16, 6.0  ;;  %v1590_v32 = vmul.f32 %v2637_v38, %v1554_v5 }
 0x238   : > { %v1621_v53 = vadd.f32 %v1589_v41, %v1521_v9  ;;  %v1090_v57 = vmul.f32 %v3028_v29, %v2626_v34  ;;  %758 = vst.msk [vmem:[#allocation2 + $0x139] sm:$0xff] %vm321_vm2, %v726_v43  ;;  %v727_v24 = vmin.f32 %v695_v44, 6.0  ;;  %v1091_v48 = vmul.f32 %v1354_v55, %v2626_v34 }
 0x239   : > { %2071 = vmatprep.subr.msk.bf16.mxu1 %vm321_vm2, %v1747_v59  ;;  %v1190_v47 = vmul.f32 %v3030_v25, %v2628_v35  ;;  %v1191_v31 = vmul.f32 %v3046_v33, %v2628_v35  ;;  %761 = vst.msk [vmem:[#allocation2 + $0x159] sm:$0xff] %vm321_vm2, %v729_v8  ;;  %v1622_v15 = vadd.f32 %v1590_v32, %v1522_v13 }
 0x23a   : > { %2019 = vmatpush3.bf16.xpose.msra.mxu1 %v2750_v42  ;;  %v1660_v19 = vadd.f32 %v2693_v61, %v1621_v53  ;;  %v1122_v49 = vadd.f32 %v1090_v57, %v1022_v21  ;;  %v1290_v54 = vmul.f32 %v1553_v10, %v2639_v39  ;;  %759 = vst.msk [vmem:[#allocation2 + $0x141] sm:$0xff] %vm321_vm2, %v727_v24 }
 0x23b   : > { %v1123_v30 = vadd.f32 %v1091_v48, %v1023_v45  ;;  %v1291_v51 = vmul.f32 %v1554_v5, %v2639_v39  ;;  %v1392_v40 = vmul.f32 %v2630_v36, %v3059_v23  ;;  %v1492_v52 = vmul.f32 %v2632_v37, %v3061_v17 }
 0x23c   : > { %v1661_v42 = vadd.f32 %v2693_v61, %v1622_v15  ;;  %v1692_v26 = vmax.f32 %v1660_v19, 0.0  ;;  %v1222_v3 = vadd.f32 %v1190_v47, %v1122_v49  ;;  %v1591_v21 = vmul.f32 %v2637_v38, %v3070_v27  ;;  %v2150_v47 = vld [vmem:[#allocation6] ss:$0 sm:$0xff] }
 0x23d   : > { %v1223_v58 = vadd.f32 %v1191_v31, %v1123_v30  ;;  %v1592_v50 = vmul.f32 %v2637_v38, %v3076_v14  ;;  %v824_v45 = vmul.f32 %v3028_v29, %v2607_v63  ;;  %v825_v16 = vmul.f32 %v1354_v55, %v2607_v63 }
 0x23e   : > { %v1693_v9 = vmax.f32 %v1661_v42, 0.0  ;;  %v1724_v41 = vmin.f32 %v1692_v26, 6.0  ;;  %v1322_v43 = vadd.f32 %v1290_v54, %v1222_v3  ;;  %v892_v44 = vmul.f32 %v3030_v25, %v2609_v0 }
 0x23f   : > { %v1323_v59 = vadd.f32 %v1291_v51, %v1223_v58  ;;  %v893_v13 = vmul.f32 %v3046_v33, %v2609_v0  ;;  %v992_v8 = vmul.f32 %v1553_v10, %v2614_v12  ;;  %v993_v32 = vmul.f32 %v1554_v5, %v2614_v12  ;;  %v2068_v57 = vpop.f32.mrb[28].mxu0 }
 0x240   : > { %v1725_v38 = vmin.f32 %v1693_v9, 6.0  ;;  %v1423_v53 = vadd.f32 %v3034_v18, %v1322_v43  ;;  %v924_v29 = vadd.f32 %v892_v44, %v824_v45  ;;  %v1092_v55 = vmul.f32 %v3024_v6, %v2626_v34  ;;  %v655_v31 = vpop.f32.mrb[29].mxu0 }
 0x241   : > { %v1424_v24 = vadd.f32 %v1392_v40, %v1323_v59  ;;  %v925_v48 = vadd.f32 %v893_v13, %v825_v16  ;;  %v1093_v25 = vmul.f32 %v3059_v23, %v2626_v34  ;;  %v1192_v33 = vmul.f32 %v3026_v4, %v2628_v35  ;;  %v2069_v49 = vpop.f32.mrb[30].mxu0  ;;  %v3111_v59 = vld [vmem:[#allocation2 + $0x138] sm:$0xff]  ;;  %v3113_v13 = vld [vmem:[#allocation2 + $0x140] sm:$0xff] }
 0x242   : > { %v664_v10 = vadd.f32 %v2150_v47, %v2068_v57  ;;  %v1748_v5 = vpack.c.bf16 %v1725_v38, %v1724_v41  ;;  %v1523_v15 = vadd.f32 %v3038_v20, %v1423_v53  ;;  %v1024_v18 = vadd.f32 %v992_v8, %v924_v29  ;;  %v658_v26 = vpop.f32.mrb[31].mxu0  ;;  %v3116_v53 = vld [vmem:[#allocation2 + $0x139] sm:$0xff]  ;;  %v3123_v57 = vld [vmem:[#allocation2 + $0x141] sm:$0xff] }
 0x243   : > { %v656_v19 = vadd.f32 %v2150_v47, %v655_v31  ;;  %v1524_v54 = vadd.f32 %v1492_v52, %v1424_v24  ;;  %v1025_v30 = vadd.f32 %v993_v32, %v925_v48  ;;  %v1193_v51 = vmul.f32 %v3061_v17, %v2628_v35  ;;  %v3125_v24 = vld [vmem:[#allocation2 + $0x13a] sm:$0xff]  ;;  %v3127_v48 = vld [vmem:[#allocation2 + $0x142] sm:$0xff] }
 0x244   : > { %v700_v40 = vmax.f32 %v664_v10, 0.0  ;;  %v667_v42 = vadd.f32 %v2150_v47, %v2069_v49  ;;  %2072 = vmatprep.subr.msk.bf16.mxu1 %vm321_vm2, %v1748_v5  ;;  %v1623_v3 = vadd.f32 %v1591_v21, %v1523_v15  ;;  %v1124_v58 = vadd.f32 %v1092_v55, %v1024_v18  ;;  %v3143_v49 = vld [vmem:[%s3539_s3 + $0x8] ss:$0 sm:$0xff] }
 0x245   : > { %v698_v45 = vmax.f32 %v656_v19, 0.0  ;;  %v659_v16 = vadd.f32 %v2150_v47, %v658_v26  ;;  %2021 = vmatpush3.bf16.xpose.msra.mxu1 %v2800_v11  ;;  %v1624_v20 = vadd.f32 %v1592_v50, %v1524_v54  ;;  %v1125_v9 = vadd.f32 %v1093_v25, %v1025_v30 }
 0x246   : > { %v732_v41 = vmin.f32 %v700_v40, 6.0  ;;  %v701_v43 = vmax.f32 %v667_v42, 0.0  ;;  %v1662_v52 = vadd.f32 %v2693_v61, %v1623_v3  ;;  %v1224_v44 = vadd.f32 %v1192_v33, %v1124_v58 }
 0x247   : > { %v730_v8 = vmin.f32 %v698_v45, 6.0  ;;  %v699_v32 = vmax.f32 %v659_v16, 0.0  ;;  %v1663_v21 = vadd.f32 %v2693_v61, %v1624_v20  ;;  %v1225_v38 = vadd.f32 %v1193_v51, %v1125_v9 }
 0x248   : > { %764 = vst.msk [vmem:[#allocation2 + $0x181] sm:$0xff] %vm321_vm2, %v732_v41  ;;  %v733_v11 = vmin.f32 %v701_v43, 6.0  ;;  %v1694_v50 = vmax.f32 %v1662_v52, 0.0  ;;  %v1292_v29 = vmul.f32 %v3070_v27, %v2639_v39  ;;  %v1293_v55 = vmul.f32 %v3076_v14, %v2639_v39  ;;  %v3163_v43 = vld [vmem:[#allocation2 + $0x150] sm:$0xff]  ;;  %v3170_v52 = vld [vmem:[#allocation2 + $0x158] sm:$0xff] }
 0x249   : > { %762 = vst.msk [vmem:[#allocation2 + $0x169] sm:$0xff] %vm321_vm2, %v730_v8  ;;  %v731_v61 = vmin.f32 %v699_v32, 6.0  ;;  %v1695_v25 = vmax.f32 %v1663_v21, 0.0  ;;  %v1393_v33 = vmul.f32 %v2630_v36, %v3111_v59  ;;  %v1394_v47 = vmul.f32 %v2630_v36, %v3113_v13 }
 0x24a   : > { %765 = vst.msk [vmem:[#allocation2 + $0x189] sm:$0xff] %vm321_vm2, %v733_v11  ;;  %v1726_v10 = vmin.f32 %v1694_v50, 6.0  ;;  %v1324_v31 = vadd.f32 %v1292_v29, %v1224_v44  ;;  %v1325_v5 = vadd.f32 %v1293_v55, %v1225_v38  ;;  %v1493_v15 = vmul.f32 %v2632_v37, %v3116_v53  ;;  %v3172_v44 = vld [vmem:[#allocation2 + $0x151] sm:$0xff]  ;;  %v3179_v38 = vld [vmem:[#allocation2 + $0x159] sm:$0xff] }
 0x24b   : > { %763 = vst.msk [vmem:[#allocation2 + $0x171] sm:$0xff] %vm321_vm2, %v731_v61  ;;  %v1727_v18 = vmin.f32 %v1695_v25, 6.0  ;;  %v1494_v19 = vmul.f32 %v2632_v37, %v3123_v57  ;;  %v1593_v54 = vmul.f32 %v3143_v49, %v3125_v24  ;;  %v1594_v30 = vmul.f32 %v3143_v49, %v3127_v48  ;;  %v3181_v11 = vld [vmem:[#allocation2 + $0x152] sm:$0xff]  ;;  %v3187_v61 = vld [vmem:[#allocation2 + $0x15a] sm:$0xff] }
 0x24c   : > { %v1425_v51 = vadd.f32 %v1393_v33, %v1324_v31  ;;  %v1426_v40 = vadd.f32 %v1394_v47, %v1325_v5  ;;  %v826_v42 = vmul.f32 %v3024_v6, %v2607_v63  ;;  %v827_v26 = vmul.f32 %v3059_v23, %v2607_v63  ;;  %v3189_v25 = vld [vmem:[#allocation8] ss:$0 sm:$0xff] }
 0x24d   : > { %v1749_v3 = vpack.c.bf16 %v1727_v18, %v1726_v10  ;;  %v894_v58 = vmul.f32 %v3026_v4, %v2609_v0  ;;  %v895_v45 = vmul.f32 %v3061_v17, %v2609_v0  ;;  %v994_v16 = vmul.f32 %v3070_v27, %v2614_v12 }
 0x24e   : > { %v1525_v20 = vadd.f32 %v1493_v15, %v1425_v51  ;;  %v1526_v9 = vadd.f32 %v1494_v19, %v1426_v40  ;;  %v995_v41 = vmul.f32 %v3076_v14, %v2614_v12  ;;  %v1094_v6 = vmul.f32 %v3111_v59, %v2626_v34 }
 0x24f   : > { %2073 = vmatprep.subr.msk.bf16.mxu1 %vm321_vm2, %v1749_v3  ;;  %v926_v23 = vadd.f32 %v894_v58, %v826_v42  ;;  %v927_v4 = vadd.f32 %v895_v45, %v827_v26  ;;  %v1095_v17 = vmul.f32 %v3113_v13, %v2626_v34  ;;  %v1194_v27 = vmul.f32 %v3116_v53, %v2628_v35 }
 0x250   : > { %2023 = vmatpush3.bf16.xpose.msra.mxu1 %v2852_v22  ;;  %v1625_v14 = vadd.f32 %v1593_v54, %v1525_v20  ;;  %v1626_v8 = vadd.f32 %v1594_v30, %v1526_v9  ;;  %v1195_v32 = vmul.f32 %v3123_v57, %v2628_v35  ;;  %v1294_v21 = vmul.f32 %v3125_v24, %v2639_v39 }
 0x251   : > { %v1026_v50 = vadd.f32 %v994_v16, %v926_v23  ;;  %v1027_v29 = vadd.f32 %v995_v41, %v927_v4  ;;  %v1295_v55 = vmul.f32 %v3127_v48, %v2639_v39  ;;  %v1395_v22 = vmul.f32 %v2630_v36, %v3163_v43 }
 0x252   : > { %v1664_v33 = vadd.f32 %v3189_v25, %v1625_v14  ;;  %v1665_v47 = vadd.f32 %v3189_v25, %v1626_v8  ;;  %v1396_v10 = vmul.f32 %v2630_v36, %v3170_v52  ;;  %v1495_v31 = vmul.f32 %v2632_v37, %v3172_v44 }
 0x253   : > { %v1126_v5 = vadd.f32 %v1094_v6, %v1026_v50  ;;  %v1127_v15 = vadd.f32 %v1095_v17, %v1027_v29  ;;  %v1496_v18 = vmul.f32 %v2632_v37, %v3179_v38  ;;  %v1595_v19 = vmul.f32 %v3143_v49, %v3181_v11 }
 0x254   : > { %v1696_v54 = vmax.f32 %v1664_v33, 0.0  ;;  %v1697_v30 = vmax.f32 %v1665_v47, 0.0  ;;  %v1596_v51 = vmul.f32 %v3143_v49, %v3187_v61  ;;  %v1511_v40 = vadd.f32 %v2904_v46, %v2929_v2 }
 0x255   : > { %v1226_v42 = vadd.f32 %v1194_v27, %v1126_v5  ;;  %v1227_v26 = vadd.f32 %v1195_v32, %v1127_v15  ;;  %v1512_v3 = vadd.f32 %v2908_v62, %v2947_v60  ;;  %v828_v58 = vmul.f32 %v3111_v59, %v2607_v63  ;;  %v3233_v5 = vld [vmem:[#allocation2 + $0x170] sm:$0xff] }
 0x256   : > { %v1728_v45 = vmin.f32 %v1696_v54, 6.0  ;;  %v1729_v16 = vmin.f32 %v1697_v30, 6.0  ;;  %v1611_v20 = vadd.f32 %v2912_v28, %v1511_v40  ;;  %v829_v9 = vmul.f32 %v3113_v13, %v2607_v63 }
 0x257   : > { %v1326_v41 = vadd.f32 %v1294_v21, %v1226_v42  ;;  %v1327_v6 = vadd.f32 %v1295_v55, %v1227_v26  ;;  %v1612_v23 = vadd.f32 %v2919_v7, %v1512_v3  ;;  %v896_v46 = vmul.f32 %v3116_v53, %v2609_v0  ;;  %v3245_v42 = vld [vmem:[#allocation2 + $0x171] sm:$0xff] }
 0x258   : > { %v1750_v2 = vpack.c.bf16 %v1729_v16, %v1728_v45  ;;  %v1650_v62 = vadd.f32 %v3189_v25, %v1611_v20  ;;  %v897_v60 = vmul.f32 %v3123_v57, %v2609_v0  ;;  %v996_v59 = vmul.f32 %v3125_v24, %v2614_v12  ;;  %v3247_v26 = vld [vmem:[#allocation2 + $0x16a] sm:$0xff]  ;;  %v3249_v3 = vld [vmem:[#allocation2 + $0x172] sm:$0xff] }
 0x259   : > { %v1427_v28 = vadd.f32 %v1395_v22, %v1326_v41  ;;  %v1428_v4 = vadd.f32 %v1396_v10, %v1327_v6  ;;  %v1651_v13 = vadd.f32 %v3189_v25, %v1612_v23  ;;  %v928_v17 = vadd.f32 %v896_v46, %v828_v58  ;;  %v3231_v10 = vld [vmem:[#allocation2 + $0x168] sm:$0xff] }
 0x25a   : > { %2074 = vmatprep.subr.msk.bf16.mxu1 %vm321_vm2, %v1750_v2  ;;  %v1682_v7 = vmax.f32 %v1650_v62, 0.0  ;;  %v929_v27 = vadd.f32 %v897_v60, %v829_v9  ;;  %v997_v53 = vmul.f32 %v3127_v48, %v2614_v12  ;;  %v1096_v14 = vmul.f32 %v3163_v43, %v2626_v34 }
 0x25b   : > { %2025 = vmatpush3.bf16.xpose.msra.mxu1 %v2915_v1  ;;  %v1527_v57 = vadd.f32 %v1495_v31, %v1427_v28  ;;  %v1528_v8 = vadd.f32 %v1496_v18, %v1428_v4  ;;  %v1683_v24 = vmax.f32 %v1651_v13, 0.0  ;;  %v1028_v32 = vadd.f32 %v996_v59, %v928_v17  ;;  %v3235_v1 = vld [vmem:[#allocation2 + $0x169] sm:$0xff] }
 0x25c   : > { %v1714_v21 = vmin.f32 %v1682_v7, 6.0  ;;  %v1029_v50 = vadd.f32 %v997_v53, %v929_v27  ;;  %v1097_v29 = vmul.f32 %v3170_v52, %v2626_v34  ;;  %v1196_v55 = vmul.f32 %v3172_v44, %v2628_v35  ;;  %v3579_v13 = vld [vmem:[#allocation19_spill] sm:$0xff]  ;;  %v3580_v53 = vld [vmem:[#allocation22_spill] sm:$0xff] }
 0x25d   : > { %v1627_v22 = vadd.f32 %v1595_v19, %v1527_v57  ;;  %v1628_v33 = vadd.f32 %v1596_v51, %v1528_v8  ;;  %v1715_v48 = vmin.f32 %v1683_v24, 6.0  ;;  %v1128_v47 = vadd.f32 %v1096_v14, %v1028_v32  ;;  %v3266_v7 = vld [vmem:[#allocation2 + $0xa8] sm:$0xff] }
 0x25e   : > { %v1129_v31 = vadd.f32 %v1097_v29, %v1029_v50  ;;  %v1197_v15 = vmul.f32 %v3179_v38, %v2628_v35  ;;  %v1296_v18 = vmul.f32 %v3181_v11, %v2639_v39  ;;  %v1297_v54 = vmul.f32 %v3187_v61, %v2639_v39  ;;  %v3581_v14 = vld [vmem:[#allocation20_spill] sm:$0xff]  ;;  %v3582_v8 = vld [vmem:[#allocation15_spill] sm:$0xff] }
 0x25f   : > { %v1666_v19 = vadd.f32 %v3189_v25, %v1627_v22  ;;  %v1667_v30 = vadd.f32 %v3189_v25, %v1628_v33  ;;  %v1743_v51 = vpack.c.bf16 %v1715_v48, %v1714_v21  ;;  %v1228_v40 = vadd.f32 %v1196_v55, %v1128_v47  ;;  %v3583_v32 = vld [vmem:[#allocation16_spill] sm:$0xff]  ;;  %v3584_v33 = vld [vmem:[#allocation21_spill] sm:$0xff] }
 0x260   : > { %v1229_v58 = vadd.f32 %v1197_v15, %v1129_v31  ;;  %v1397_v45 = vmul.f32 %v2630_v36, %v3231_v10  ;;  %v1398_v16 = vmul.f32 %v2630_v36, %v3233_v5  ;;  %v1497_v20 = vmul.f32 %v2632_v37, %v3235_v1  ;;  %v3274_v50 = vld [vmem:[#allocation2 + $0xb0] sm:$0xff] }
 0x261   : > { %v1698_v9 = vmax.f32 %v1666_v19, 0.0  ;;  %v1699_v41 = vmax.f32 %v1667_v30, 0.0  ;;  %v1777_v6 = vsel %vm321_vm2, %v1743_v51, 0  ;;  %v1328_v23 = vadd.f32 %v1296_v18, %v1228_v40  ;;  %v3276_v29 = vld [vmem:[#allocation2 + $0xa9] sm:$0xff]  ;;  %v3585_v48 = vld [vmem:[#allocation17_spill] sm:$0xff]  ;;  %v3587_v30 = vld [vmem:[#allocation18_spill] sm:$0xff] }
 0x262   : > { %v1329_v46 = vadd.f32 %v1297_v54, %v1229_v58  ;;  %v1498_v2 = vmul.f32 %v2632_v37, %v3245_v42  ;;  %v1597_v62 = vmul.f32 %v3143_v49, %v3247_v26  ;;  %v1598_v60 = vmul.f32 %v3143_v49, %v3249_v3  ;;  %v3281_v31 = vld [vmem:[#allocation2 + $0xb1] sm:$0xff]  ;;  %v3586_v54 = vld [vmem:[#allocation23_spill] sm:$0xff] }
 0x263   : > { %v1730_v59 = vmin.f32 %v1698_v9, 6.0  ;;  %v1731_v28 = vmin.f32 %v1699_v41, 6.0  ;;  %v1429_v4 = vadd.f32 %v1397_v45, %v1328_v23  ;;  %v1012_v17 = vadd.f32 %v3579_v13, %v2949_v56  ;;  %v3283_v15 = vld [vmem:[#allocation2 + $0xaa] sm:$0xff]  ;;  %v3290_v58 = vld [vmem:[#allocation2 + $0xb2] sm:$0xff] }
 0x264   : > { %v1430_v27 = vadd.f32 %v1398_v16, %v1329_v46  ;;  %v1013_v57 = vadd.f32 %v3581_v14, %v3580_v53  ;;  %v1180_v24 = vmul.f32 %v3582_v8, %v2628_v35  ;;  %v1181_v21 = vmul.f32 %v3583_v32, %v2628_v35 }
 0x265   : > { %v1751_v55 = vpack.c.bf16 %v1731_v28, %v1730_v59  ;;  %v1529_v22 = vadd.f32 %v1497_v20, %v1429_v4  ;;  %v1112_v56 = vadd.f32 %v3584_v33, %v1012_v17  ;;  %v1280_v47 = vmul.f32 %v3585_v48, %v2639_v39 }
 0x266   : > { %v1530_v18 = vadd.f32 %v1498_v2, %v1430_v27  ;;  %v1113_v19 = vadd.f32 %v3586_v54, %v1013_v57  ;;  %v1281_v51 = vmul.f32 %v3587_v30, %v2639_v39  ;;  %v1381_v40 = vmul.f32 %v2630_v36, %v3266_v7 }
 0x267   : > { %2075 = vmatprep.subr.msk.bf16.mxu1 %vm321_vm2, %v1751_v55  ;;  %v1629_v45 = vadd.f32 %v1597_v62, %v1529_v22  ;;  %v1212_v16 = vadd.f32 %v1180_v24, %v1112_v56  ;;  %v1382_v20 = vmul.f32 %v2630_v36, %v3274_v50  ;;  %v1481_v9 = vmul.f32 %v2632_v37, %v3276_v29 }
 0x268   : > { %2027 = vmatpush3.bf16.xpose.msra.mxu1 %v1777_v6  ;;  %v1630_v41 = vadd.f32 %v1598_v60, %v1530_v18  ;;  %v1213_v23 = vadd.f32 %v1181_v21, %v1113_v19  ;;  %v1482_v46 = vmul.f32 %v2632_v37, %v3281_v31  ;;  %v1581_v2 = vmul.f32 %v3143_v49, %v3283_v15 }
 0x269   : > { %v1668_v59 = vadd.f32 %v3189_v25, %v1629_v45  ;;  %v1312_v28 = vadd.f32 %v1280_v47, %v1212_v16  ;;  %v1582_v62 = vmul.f32 %v3143_v49, %v3290_v58  ;;  %v830_v4 = vmul.f32 %v3163_v43, %v2607_v63 }
 0x26a   : > { %v1669_v13 = vadd.f32 %v3189_v25, %v1630_v41  ;;  %v1313_v6 = vadd.f32 %v1281_v51, %v1213_v23  ;;  %v831_v60 = vmul.f32 %v3170_v52, %v2607_v63  ;;  %v898_v17 = vmul.f32 %v3172_v44, %v2609_v0  ;;  %v3323_v51 = vld [vmem:[#allocation2 + $0x180] sm:$0xff]  ;;  %v3331_v41 = vld [vmem:[#allocation2 + $0x189] sm:$0xff] }
 0x26b   : > { %v1700_v27 = vmax.f32 %v1668_v59, 0.0  ;;  %v1413_v53 = vadd.f32 %v1381_v40, %v1312_v28  ;;  %v899_v14 = vmul.f32 %v3179_v38, %v2609_v0  ;;  %v998_v57 = vmul.f32 %v3181_v11, %v2614_v12  ;;  %v3338_v28 = vld [vmem:[#allocation2 + $0x182] sm:$0xff] }
 0x26c   : > { %v1701_v24 = vmax.f32 %v1669_v13, 0.0  ;;  %v1414_v21 = vadd.f32 %v1382_v20, %v1313_v6  ;;  %v930_v43 = vadd.f32 %v898_v17, %v830_v4  ;;  %v999_v55 = vmul.f32 %v3187_v61, %v2614_v12  ;;  %v3325_v61 = vld [vmem:[#allocation2 + $0x188] sm:$0xff] }
 0x26d   : > { %v1732_v22 = vmin.f32 %v1700_v27, 6.0  ;;  %v1513_v33 = vadd.f32 %v1481_v9, %v1413_v53  ;;  %v931_v52 = vadd.f32 %v899_v14, %v831_v60  ;;  %v1098_v44 = vmul.f32 %v3231_v10, %v2626_v34  ;;  %v3329_v9 = vld [vmem:[#allocation2 + $0x181] sm:$0xff] }
 0x26e   : > { %v1733_v56 = vmin.f32 %v1701_v24, 6.0  ;;  %v1514_v47 = vadd.f32 %v1482_v46, %v1414_v21  ;;  %v1030_v18 = vadd.f32 %v998_v57, %v930_v43  ;;  %v1099_v38 = vmul.f32 %v3233_v5, %v2626_v34  ;;  %v3588_v21 = vld [vmem:[#allocation13_spill] sm:$0xff] }
 0x26f   : > { %v1613_v54 = vadd.f32 %v1581_v2, %v1513_v33  ;;  %v1031_v11 = vadd.f32 %v999_v55, %v931_v52  ;;  %v1198_v19 = vmul.f32 %v3235_v1, %v2628_v35  ;;  %v1199_v20 = vmul.f32 %v3245_v42, %v2628_v35  ;;  %v3589_v33 = vld [vmem:[#allocation14_spill] sm:$0xff] }
 0x270   : > { %v1752_v40 = vpack.c.bf16 %v1733_v56, %v1732_v22  ;;  %v1614_v45 = vadd.f32 %v1582_v62, %v1514_v47  ;;  %v1130_v16 = vadd.f32 %v1098_v44, %v1030_v18  ;;  %v1298_v2 = vmul.f32 %v3247_v26, %v2639_v39  ;;  %v3358_v18 = vld [vmem:[#allocation2 + $0x18a] sm:$0xff] }
 0x271   : > { %v1652_v23 = vadd.f32 %v3189_v25, %v1613_v54  ;;  %v1131_v46 = vadd.f32 %v1099_v38, %v1031_v11  ;;  %v1299_v59 = vmul.f32 %v3249_v3, %v2639_v39  ;;  %v1399_v13 = vmul.f32 %v2630_v36, %v3323_v51 }
 0x272   : > { %2076 = vmatprep.subr.msk.bf16.mxu1 %vm321_vm2, %v1752_v40  ;;  %v1653_v62 = vadd.f32 %v3189_v25, %v1614_v45  ;;  %v1230_v4 = vadd.f32 %v1198_v19, %v1130_v16  ;;  %v1400_v6 = vmul.f32 %v2630_v36, %v3325_v61  ;;  %v1499_v27 = vmul.f32 %v2632_v37, %v3329_v9 }
 0x273   : > { %v1684_v60 = vmax.f32 %v1652_v23, 0.0  ;;  %v1231_v17 = vadd.f32 %v1199_v20, %v1131_v46  ;;  %v1500_v53 = vmul.f32 %v2632_v37, %v3331_v41  ;;  %v1599_v24 = vmul.f32 %v3143_v49, %v3338_v28 }
 0x274   : > { %v1685_v14 = vmax.f32 %v1653_v62, 0.0  ;;  %v1330_v57 = vadd.f32 %v1298_v2, %v1230_v4  ;;  %v814_v43 = vmul.f32 %v3588_v21, %v2607_v63  ;;  %v815_v52 = vmul.f32 %v3589_v33, %v2607_v63  ;;  %v3389_v21 = vld [vmem:[#allocation2 + $0xc2] sm:$0xff] }
 0x275   : > { %v1716_v55 = vmin.f32 %v1684_v60, 6.0  ;;  %v1331_v22 = vadd.f32 %v1299_v59, %v1231_v17  ;;  %v882_v44 = vmul.f32 %v3582_v8, %v2609_v0  ;;  %v883_v38 = vmul.f32 %v3583_v32, %v2609_v0  ;;  %v3374_v59 = vld [vmem:[#allocation2 + $0xc0] sm:$0xff]  ;;  %v3383_v17 = vld [vmem:[#allocation2 + $0xc9] sm:$0xff] }
 0x276   : > { %v1717_v56 = vmin.f32 %v1685_v14, 6.0  ;;  %v1431_v47 = vadd.f32 %v1399_v13, %v1330_v57  ;;  %v982_v54 = vmul.f32 %v3585_v48, %v2614_v12  ;;  %v983_v40 = vmul.f32 %v3587_v30, %v2614_v12  ;;  %v3376_v30 = vld [vmem:[#allocation2 + $0xc8] sm:$0xff] }
 0x277   : > { %v1432_v11 = vadd.f32 %v1400_v6, %v1331_v22  ;;  %v914_v19 = vadd.f32 %v882_v44, %v814_v43  ;;  %v1082_v45 = vmul.f32 %v3266_v7, %v2626_v34  ;;  %v915_v20 = vadd.f32 %v883_v38, %v815_v52  ;;  %v3381_v60 = vld [vmem:[#allocation2 + $0xc1] sm:$0xff] }
 0x278   : > { %v1744_v16 = vpack.c.bf16 %v1717_v56, %v1716_v55  ;;  %v1531_v8 = vadd.f32 %v1499_v27, %v1431_v47  ;;  %v1083_v23 = vmul.f32 %v3274_v50, %v2626_v34  ;;  %v1600_v32 = vmul.f32 %v3143_v49, %v3358_v18  ;;  %v3401_v47 = vld [vmem:[#allocation2 + $0xca] sm:$0xff] }
 0x279   : > { %v1532_v46 = vadd.f32 %v1500_v53, %v1432_v11  ;;  %v1014_v2 = vadd.f32 %v982_v54, %v914_v19  ;;  %v1182_v48 = vmul.f32 %v3276_v29, %v2628_v35  ;;  %v1015_v13 = vadd.f32 %v983_v40, %v915_v20 }
 0x27a   : > { %v1780_v62 = vsel %vm321_vm2, %v1744_v16, 0  ;;  %v1631_v4 = vadd.f32 %v1599_v24, %v1531_v8  ;;  %v1183_v6 = vmul.f32 %v3281_v31, %v2628_v35  ;;  %v1282_v14 = vmul.f32 %v3283_v15, %v2639_v39 }
 0x27b   : > { %2029 = vmatpush3.bf16.xpose.msra.mxu1 %v1780_v62  ;;  %v1632_v27 = vadd.f32 %v1600_v32, %v1532_v46  ;;  %v1114_v53 = vadd.f32 %v1082_v45, %v1014_v2  ;;  %v1283_v57 = vmul.f32 %v3290_v58, %v2639_v39  ;;  %v1115_v43 = vadd.f32 %v1083_v23, %v1015_v13 }
 0x27c   : > { %v1670_v24 = vadd.f32 %v3189_v25, %v1631_v4  ;;  %v1383_v55 = vmul.f32 %v2630_v36, %v3374_v59  ;;  %v1384_v22 = vmul.f32 %v2630_v36, %v3376_v30  ;;  %v1483_v44 = vmul.f32 %v2632_v37, %v3381_v60 }
 0x27d   : > { %v1671_v33 = vadd.f32 %v3189_v25, %v1632_v27  ;;  %v1214_v52 = vadd.f32 %v1182_v48, %v1114_v53  ;;  %v1484_v56 = vmul.f32 %v2632_v37, %v3383_v17  ;;  %v1215_v54 = vadd.f32 %v1183_v6, %v1115_v43 }
 0x27e   : > { %v1702_v38 = vmax.f32 %v1670_v24, 0.0  ;;  %v1583_v11 = vmul.f32 %v3143_v49, %v3389_v21  ;;  %v832_v19 = vmul.f32 %v3231_v10, %v2607_v63  ;;  %v833_v16 = vmul.f32 %v3233_v5, %v2607_v63 }
 0x27f   : > { %v1703_v40 = vmax.f32 %v1671_v33, 0.0  ;;  %v1314_v45 = vadd.f32 %v1282_v14, %v1214_v52  ;;  %v900_v8 = vmul.f32 %v3235_v1, %v2609_v0  ;;  %v1315_v20 = vadd.f32 %v1283_v57, %v1215_v54  ;;  %v1365_v14 = vld [vmem:[#allocation2 + $0x198] sm:$0xff] }
 0x280   : > { %v1584_v23 = vmul.f32 %v3143_v49, %v3401_v47  ;;  %v901_v46 = vmul.f32 %v3245_v42, %v2609_v0  ;;  %v1000_v32 = vmul.f32 %v3247_v26, %v2614_v12  ;;  %v1734_v2 = vmin.f32 %v1702_v38, 6.0  ;;  %v1366_v26 = vld [vmem:[#allocation2 + $0x1a0] sm:$0xff] }
 0x281   : > { %v1735_v10 = vmin.f32 %v1703_v40, 6.0  ;;  %v1415_v48 = vadd.f32 %v1383_v55, %v1314_v45  ;;  %v932_v62 = vadd.f32 %v900_v8, %v832_v19  ;;  %v1416_v4 = vadd.f32 %v1384_v22, %v1315_v20  ;;  %v1466_v22 = vld [vmem:[#allocation2 + $0x1a1] sm:$0xff] }
 0x282   : > { %v933_v13 = vadd.f32 %v901_v46, %v833_v16  ;;  %v1001_v5 = vmul.f32 %v3249_v3, %v2614_v12  ;;  %v1100_v1 = vmul.f32 %v3323_v51, %v2626_v34  ;;  %v1101_v42 = vmul.f32 %v3325_v61, %v2626_v34  ;;  %v1465_v3 = vld [vmem:[#allocation2 + $0x199] sm:$0xff]  ;;  %v1566_v16 = vld [vmem:[#allocation2 + $0x1a2] sm:$0xff] }
 0x283   : > { %v1753_v6 = vpack.c.bf16 %v1735_v10, %v1734_v2  ;;  %v1515_v27 = vadd.f32 %v1483_v44, %v1415_v48  ;;  %v1032_v53 = vadd.f32 %v1000_v32, %v932_v62  ;;  %v1516_v57 = vadd.f32 %v1484_v56, %v1416_v4  ;;  %v1565_v44 = vld [vmem:[#allocation2 + $0x19a] sm:$0xff] }
 0x284   : > { %v1033_v24 = vadd.f32 %v1001_v5, %v933_v13  ;;  %v1200_v43 = vmul.f32 %v3329_v9, %v2628_v35  ;;  %v1201_v55 = vmul.f32 %v3331_v41, %v2628_v35  ;;  %v1300_v52 = vmul.f32 %v3338_v28, %v2639_v39 }
 0x285   : > { %2077 = vmatprep.subr.msk.bf16.mxu1 %vm321_vm2, %v1753_v6  ;;  %v1615_v51 = vadd.f32 %v1583_v11, %v1515_v27  ;;  %v1132_v33 = vadd.f32 %v1100_v1, %v1032_v53  ;;  %v1301_v61 = vmul.f32 %v3358_v18, %v2639_v39  ;;  %v1616_v56 = vadd.f32 %v1584_v23, %v1516_v57 }
 0x286   : > { %v1133_v38 = vadd.f32 %v1101_v42, %v1033_v24  ;;  %v1401_v9 = vmul.f32 %v2630_v36, %v1365_v14  ;;  %v1402_v54 = vmul.f32 %v2630_v36, %v1366_v26  ;;  %v1501_v40 = vmul.f32 %v2632_v37, %v1465_v3  ;;  %v1349_v14 = vld [vmem:[#allocation2 + $0xd8] sm:$0xff] }
 0x287   : > { %v1654_v41 = vadd.f32 %v3189_v25, %v1615_v51  ;;  %v1232_v19 = vadd.f32 %v1200_v43, %v1132_v33  ;;  %v1502_v11 = vmul.f32 %v2632_v37, %v1466_v22  ;;  %v1655_v45 = vadd.f32 %v3189_v25, %v1616_v56  ;;  %v1350_v43 = vld [vmem:[#allocation2 + $0xe0] sm:$0xff] }
 0x288   : > { %v1233_v28 = vadd.f32 %v1201_v55, %v1133_v38  ;;  %v1601_v18 = vmul.f32 %v3143_v49, %v1565_v44  ;;  %v816_v8 = vmul.f32 %v3266_v7, %v2607_v63  ;;  %v817_v46 = vmul.f32 %v3274_v50, %v2607_v63  ;;  %v1450_v56 = vld [vmem:[#allocation2 + $0xe1] sm:$0xff] }
 0x289   : > { %v1686_v20 = vmax.f32 %v1654_v41, 0.0  ;;  %v1332_v23 = vadd.f32 %v1300_v52, %v1232_v19  ;;  %v884_v32 = vmul.f32 %v3276_v29, %v2609_v0  ;;  %v1687_v2 = vmax.f32 %v1655_v45, 0.0 }
 0x28a   : > { %v1333_v10 = vadd.f32 %v1301_v61, %v1233_v28  ;;  %v885_v48 = vmul.f32 %v3281_v31, %v2609_v0  ;;  %v984_v62 = vmul.f32 %v3283_v15, %v2614_v12  ;;  %v1602_v7 = vmul.f32 %v3143_v49, %v1566_v16  ;;  %v1449_v61 = vld [vmem:[#allocation2 + $0xd9] sm:$0xff] }
 0x28b   : > { %v1718_v4 = vmin.f32 %v1686_v20, 6.0  ;;  %v1433_v13 = vadd.f32 %v1401_v9, %v1332_v23  ;;  %v916_v5 = vadd.f32 %v884_v32, %v816_v8  ;;  %v1719_v1 = vmin.f32 %v1687_v2, 6.0  ;;  %v1549_v9 = vld [vmem:[#allocation2 + $0xda] sm:$0xff] }
 0x28c   : > { %v1434_v6 = vadd.f32 %v1402_v54, %v1333_v10  ;;  %v917_v27 = vadd.f32 %v885_v48, %v817_v46  ;;  %v985_v63 = vmul.f32 %v3290_v58, %v2614_v12  ;;  %v1084_v53 = vmul.f32 %v3374_v59, %v2626_v34 }
 0x28d   : > { %v1533_v50 = vadd.f32 %v1501_v40, %v1433_v13  ;;  %v1016_v29 = vadd.f32 %v984_v62, %v916_v5  ;;  %v1745_v0 = vpack.c.bf16 %v1719_v1, %v1718_v4  ;;  %v1085_v15 = vmul.f32 %v3376_v30, %v2626_v34 }
 0x28e   : > { %v1534_v31 = vadd.f32 %v1502_v11, %v1434_v6  ;;  %v1017_v42 = vadd.f32 %v985_v63, %v917_v27  ;;  %v1184_v24 = vmul.f32 %v3381_v60, %v2628_v35  ;;  %v1185_v59 = vmul.f32 %v3383_v17, %v2628_v35  ;;  %v1755_v35 = vld [vmem:[%s3542_s6] sm:$0xff] }
 0x28f   : > { %v1633_v26 = vadd.f32 %v1601_v18, %v1533_v50  ;;  %v1116_v57 = vadd.f32 %v1084_v53, %v1016_v29  ;;  %v1783_v12 = vsel %vm321_vm2, %v1745_v0, 0  ;;  %v1284_v34 = vmul.f32 %v3389_v21, %v2639_v39  ;;  %v2154_v27 = vld [vmem:[%s2532_s29] sm:$0xff]  ;;  %v2155_v29 = vld [vmem:[%s2532_s29 + $0x8] sm:$0xff]  ;;  %s2319_s29 = smov [#allocation9]  }
 0x290   : > { %v1634_v58 = vadd.f32 %v1602_v7, %v1534_v31  ;;  %v1117_v55 = vadd.f32 %v1085_v15, %v1017_v42  ;;  %2031 = vmatpush3.bf16.xpose.msra.mxu1 %v1783_v12  ;;  %v1385_v30 = vmul.f32 %v2630_v36, %v1349_v14  ;;  %v1285_v33 = vmul.f32 %v3401_v47, %v2639_v39  ;;  %v1550_v39 = vld [vmem:[#allocation2 + $0xe2] sm:$0xff]  ;;  %s2246_s21 = sshll.u32 %s2319_s29, 4  ;;  %s2247_s21 = int_to_ptr.vmem [resolvable:$false] %s2246_s21 }
 0x291   : > { %v1672_v3 = vadd.f32 %v3189_v25, %v1633_v26  ;;  %v1216_v22 = vadd.f32 %v1184_v24, %v1116_v57  ;;  %v1386_v52 = vmul.f32 %v2630_v36, %v1350_v43  ;;  %v2318_v54 = vmov 0   ;;  %s2248_s23 = scalar_lea.vmem %s2247_s21, 512  ;;  %p2249_p8 = scmp.lt.s32.totalorder %s3494_s12, %s2247_s21 }
 0x292   : > { %v1673_v51 = vadd.f32 %v3189_v25, %v1634_v58  ;;  %v1217_v60 = vadd.f32 %v1185_v59, %v1117_v55  ;;  %2148 = vset.pattern.permute.xlu1 %v2318_v54  ;;  %2149 = vset.pattern.permute.xlu0 %v2318_v54  ;;  %v1485_v19 = vmul.f32 %v2632_v37, %v1449_v61  ;;  %p2250_p12 = scmp.lt.s32.totalorder %s2248_s23, %s2242_s22 }
 0x293   : > { %v1704_v17 = vmax.f32 %v1672_v3, 0.0  ;;  %v1316_v44 = vadd.f32 %v1284_v34, %v1216_v22  ;;  %1758 = vperm.xlu1 %2148, %v1755_v35   ;;  %v1486_v11 = vmul.f32 %v2632_v37, %v1450_v56  ;;  %v1585_v28 = vmul.f32 %v3143_v49, %v1549_v9 }
 0x294   : > { %v1705_v38 = vmax.f32 %v1673_v51, 0.0  ;;  %v1317_v21 = vadd.f32 %v1285_v33, %v1217_v60  ;;  %v1586_v8 = vmul.f32 %v3143_v49, %v1550_v39  ;;  %v2153_v49 = vld [vmem:[%s3541_s5] sm:$0xf]  ;;  %p2251_p3 = por %p2250_p12, %p2249_p8 }
 0x295   : > { %v1417_v41 = vadd.f32 %v1385_v30, %v1316_v44  ;;  %v1736_v36 = vmin.f32 %v1704_v17, 6.0 }
 0x296   : > { %v1737_v47 = vmin.f32 %v1705_v38, 6.0  ;;  %v1418_v40 = vadd.f32 %v1386_v52, %v1317_v21  ;;  %p2252_p7 = pnand %p2251_p3, %p2245_p4 }
 0x297   : > { %v1517_v45 = vadd.f32 %v1485_v19, %v1417_v41 }
 0x298   : > { %v1754_v16 = vpack.c.bf16 %v1737_v47, %v1736_v36  ;;  %v1518_v18 = vadd.f32 %v1486_v11, %v1418_v40 }
 0x299   : > { %v1617_v20 = vadd.f32 %v1585_v28, %v1517_v45 }
 0x29a   : > { %2078 = vmatprep.subr.msk.bf16.mxu1 %vm321_vm2, %v1754_v16  ;;  %v1618_v23 = vadd.f32 %v1586_v8, %v1518_v18 }
 0x29b   : > { %v1656_v46 = vadd.f32 %v3189_v25, %v1617_v20 }
 0x29c   : > { %v1657_v32 = vadd.f32 %v3189_v25, %v1618_v23 }
 0x29d   : > { %v1688_v2 = vmax.f32 %v1656_v46, 0.0 }
 0x29e   : > { %v1689_v10 = vmax.f32 %v1657_v32, 0.0 }
 0x29f   : > { %v1720_v37 = vmin.f32 %v1688_v2, 6.0 }
 0x2a0   : > { %v1721_v48 = vmin.f32 %v1689_v10, 6.0 }
 0x2a2   : > { %v1746_v62 = vpack.c.bf16 %v1721_v48, %v1720_v37 }
 0x2a4   : > { %v1786_v4 = vsel %vm321_vm2, %v1746_v62, 0 }
 0x2a5   : > { %2033 = vmatpush3.bf16.xpose.msra.mxu1 %v1786_v4 }
 0x2ac   : > { %2035 = vmatmul.mubr.msk.bf16.vlgmr.msra.gmra.mrb[0].mxu1 %vm321_vm2, %v2153_v49 }
 0x312   : > { %v1759_v13 = vpop.permute.xlu1 %1758 }
 0x37f   : > { %v1846_v7 = vpop.f32.mrb[0].mxu1 }
 0x380   : > { %v1847_v5 = vadd.f32 %v1846_v7, %v1759_v13  ;;  %v1848_v25 = vpop.f32.mrb[1].mxu1 }
 0x381   : > { %v1849_v1 = vadd.f32 %v1848_v25, %v1759_v13  ;;  %v1850_v6 = vpop.f32.mrb[2].mxu1 }
 0x382   : > { %v1853_v63 = vadd.f32 %v2154_v27, %v1847_v5  ;;  %v1851_v50 = vpop.f32.mrb[3].mxu1 }
 0x383   : > { %v1854_v53 = vadd.f32 %v2155_v29, %v1849_v1 }
 0x384   : > { %1855 = vst [vmem:[%s319_s10] sm:$0xff] %v1853_v63 }
 0x385   : > { %1856 = vst [vmem:[%s319_s10 + $0x8] sm:$0xff] %v1854_v53 }
 0x386   : > { %2255 = shalt.err (!%p2252_p7)
}
 0x387   : > { %s2256_s17 = scalar_lea.hbm %s3492_s18, 256  ;;  %s2260_s30 = scalar_lea.hbm %s3543_s7, 512 }
 0x388   : > { %p2257_p10 = scmp.ne.s32.totalorder %s3492_s18, %s2256_s17  ;;  %p2261_p0 = scmp.lt.u32.totalorder %s3492_s18, %s3543_s7 }
 0x389   : > { %p2262_p11 = scmp.lt.u32.totalorder %s2260_s30, %s2256_s17  ;;  %p2264_p2 = scmp.lt.u32.totalorder %s2256_s17, %s3492_s18 }
 0x38a   : > { %p2258_p13 = pnand %p2257_p10, %p2480_p6 }
 0x38b   : > { %p2263_p9 = por %p2262_p11, %p2261_p0 }
 0x38c   : > { %p2259_p5 = pneg %p2258_p13 }
 0x38d   : > { %p2265_p1 = por %p2264_p2, %p2263_p9 }
 0x38f   : > { %p2266_p4 = pnand %p2265_p1, %p2259_p5 }
 0x391   : > { %2269 = shalt.err (!%p2266_p4)
}
 0x392   : > { %2089 = dma.vmem_to_hbm [thread:$0]  (%p2480_p6), %s3494_s12, 256, %s3492_s18, %s1858_s28  }
 0x393 PF: > { %s1884_s20 = sand.u32 1, %s2300_s24   ;;  %p3590_p8 = scmp.ne.s32.totalorder %s3558_s8, 0 }
 0x394   : > { %p3591_p12 = scmp.ge.s32.totalorder %s2312_s27, 2  ;;  %s1885_s16 = scalar_lea.sflag [#allocation5], %s1884_s20 }
 0x396   : > { %p2103_p3 = pnand %p3591_p12, %p3590_p8 }
 0x398   : > { %2295 = dma.done.wait (!%p2103_p3), %s1885_s16, 256  }
 0x399   : > { %2297 = vsyncadd (!%p2103_p3), %s1885_s16, 4294967040  ;;  %p21_p7 = scmp.ge.s32.totalorder %s2416_s15, 4   ;;  %s3592_s24 = smov %s2304_s25 }
 0x39a   : > { %s3593_s25 = smov %s2308_s26  ;;  %s3594_s26 = smov %s2476_s14 }
 0x39b   : > { %s3595_s27 = smov %s2416_s15  ;;  %23 = sbr.rel (!%p21_p7) target bundleno = 6 (0x6), region = 104 }
 0x3a2   :  { %1890 = vsyncpa [#allocation4], 1 }
 0x3a3   :  { %1892 = vsyncpa [#allocation4 + $0x1], 1 }
 0x3a4   :  { %1893 = vsyncpa [#allocation7], 1 }
 0x3a5   :  { %1894 = vsyncpa [#allocation5], 1 }
 0x3a6   :  { %1896 = vsyncpa [#allocation5 + $0x1], 1 }

</bundles_post_ra>
